<compile_context>
chip_gen: v7x
topology: tpu7x:2x2x1
jax: 0.10.0
libtpu: 0.0.40
codegen_flags: <defaults>
</compile_context>

<pallas_src>
import functools

import jax
import jax.numpy as jnp
from jax import lax
from jax.experimental import pallas as pl
from jax.experimental.pallas import tpu as pltpu

TEMPERATURE = 0.07
EPSILON = 1e-8
MAX_MARGIN = 10.0
HARD_NEGATIVE_WEIGHT = 1.0
CLASS_BALANCE = True


def _round_up(x, m):
    return (x + m - 1) // m * m


def _choose_tiles(b, d, itemsize, block_size=None):
    """Pick padded sizes, a lane-dense tile, and a generation-aware VMEM limit."""
    d_pad = _round_up(d, 128)

    try:
        phys_vmem = getattr(pltpu.get_tpu_info(), "vmem_capacity_bytes", 128 << 20)
    except Exception:  # pragma: no cover - conservative fallback
        phys_vmem = 128 << 20
    # Leave headroom for compiler scratch / pipelining; matters on v7x (64 MiB).
    vmem_limit = int(min(phys_vmem * 3 // 4, 64 << 20))
    budget = vmem_limit - (4 << 20)

    def fits(t):
        inputs = 2 * 2 * t * d_pad * itemsize      # row+col operands, double-buffered
        interm = 4 * t * t * 4                     # sim / e / eqf / masked-e f32 temps
        scratch = 3 * t * 4 + 2 * 8 * 128 * 4      # accumulators + output block
        return inputs + interm + scratch <= budget

    if block_size is not None:
        assert block_size % 128 == 0, "block_size must be a multiple of 128"
        tile = block_size
    else:
        candidates = [t for t in (512, 384, 256, 128) if fits(t)] or [128]
        # Trade padded O(B_pad^2) work against per-grid-step overhead / MXU fill.
        tile = min(candidates,
                   key=lambda t: (_round_up(b, t) ** 2) * (1.0 + 64.0 / t))
    b_pad = _round_up(b, tile)
    return b_pad, d_pad, tile, vmem_limit


def _infonce_kernel(fp_row_ref, fp_col_ref, lab_rows_ref, lab_cols_ref, out_ref,
                    pos_acc, sum_acc, cnt_acc, *,
                    b_actual, n_pad, tile_m, tile_n, class_balance,
                    epsilon, max_margin):
    i = pl.program_id(0)                    # row-block index (parallel / megacore)
    k = pl.program_id(1)                    # column-block index (reduction axis)
    n_col = pl.num_programs(1)

    # ---- per-row-block accumulators reset at the start of each column sweep ----
    @pl.when(k == 0)
    def _():
        pos_acc[...] = jnp.zeros_like(pos_acc)
        sum_acc[...] = jnp.zeros_like(sum_acc)
        cnt_acc[...] = jnp.zeros_like(cnt_acc)

    # ---- similarity block on the MXU.  Operands are pre-normalized in the
    #      wrapper and the row side is pre-scaled by 1/temperature, so the
    #      result is already sim/T.  Contraction over the last dim of both
    #      operands == A @ A^T without materializing a transpose. ----
    sim = lax.dot_general(fp_row_ref[...], fp_col_ref[...],
                          dimension_numbers=(((1,), (1,)), ((), ())),
                          preferred_element_type=jnp.float32)
    e = jnp.exp(jnp.clip(sim, -max_margin, max_margin))                  # [TM, TN]

    # ---- label-equality block; padded columns carry a sentinel label so they
    #      never match a real row ----
    eqf = (lab_rows_ref[...] == lab_cols_ref[...]).astype(jnp.float32)   # [TM, TN]

    cnt_acc[...] += jnp.sum(eqf, axis=1, keepdims=True)   # class counts (incl. self)

    # Off-diagonal blocks: no self-similarity present -> plain accumulation.
    @pl.when(i != k)
    def _():
        pos_acc[...] += jnp.sum(e * eqf, axis=1, keepdims=True)
        sum_acc[...] += jnp.sum(e, axis=1, keepdims=True)

    # Diagonal block (one per row sweep): zero the self-similarity entries so
    # the positive/negative sums never contain exp(diag).
    @pl.when(i == k)
    def _():
        r_loc = lax.broadcasted_iota(jnp.int32, (tile_m, tile_n), 0)
        c_loc = lax.broadcasted_iota(jnp.int32, (tile_m, tile_n), 1)
        e_off = jnp.where(r_loc == c_loc, 0.0, e)
        pos_acc[...] += jnp.sum(e_off * eqf, axis=1, keepdims=True)
        sum_acc[...] += jnp.sum(e_off, axis=1, keepdims=True)

    # ---- per-row-block finalize at the end of the column sweep: emit four
    #      scalar partials into a lane-dense [8, 128] output block (no cross-
    #      row-block state -> axis 0 can be sharded across TensorCores). ----
    @pl.when(k == n_col - 1)
    def _():
        pos_sim = pos_acc[...]                                          # [TM, 1]
        # Padded columns (zero fingerprints) each contributed exp(0) = 1.
        neg_sim = (sum_acc[...] - jnp.float32(n_pad)) - pos_sim
        counts = cnt_acc[...]

        raw = -jnp.log(pos_sim / (pos_sim + neg_sim + epsilon))
        if class_balance:
            r = 1.0 / counts              # counts >= 1 for real rows (self match)
        else:
            r = jnp.ones_like(counts)
        q = raw * r
        nz = (pos_sim > 0.0).astype(jnp.float32)

        row_idx = i * tile_m + lax.broadcasted_iota(jnp.int32, (tile_m, 1), 0)
        valid = row_idx < b_actual
        zero = jnp.zeros_like(q)
        s_qnz = jnp.sum(jnp.where(valid, q * nz, zero))   # sum_i raw_i*r_i*nz_i
        s_nz = jnp.sum(jnp.where(valid, nz, zero))        # sum_i nz_i
        s_r = jnp.sum(jnp.where(valid, r, zero))          # sum_i r_i
        s_q = jnp.sum(jnp.where(valid, q, zero))          # sum_i raw_i*r_i

        sub = lax.broadcasted_iota(jnp.int32, (8, 128), 0)
        lane = lax.broadcasted_iota(jnp.int32, (8, 128), 1)
        blk = jnp.where((sub == 0) & (lane == 0), s_qnz, 0.0)
        blk = jnp.where((sub == 0) & (lane == 1), s_nz, blk)
        blk = jnp.where((sub == 0) & (lane == 2), s_r, blk)
        blk = jnp.where((sub == 0) & (lane == 3), s_q, blk)
        out_ref[...] = blk


@functools.partial(jax.jit, static_argnames=("block_size", "use_bf16_matmul"))
def advanced_infonce_loss(fingerprints, labels, block_size=None,
                          use_bf16_matmul=False):
    """fingerprints: [B, D] float; labels: [B] int. Returns scalar f32 loss."""
    b, d = fingerprints.shape
    inv_temp = 1.0 / TEMPERATURE

    # ---- one mem-bound O(B*D) pass: L2 normalize (F.normalize, eps=1e-12) and
    #      fold 1/temperature into the row-side operand ----
    fp = fingerprints.astype(jnp.float32)
    norm = jnp.sqrt(jnp.sum(fp * fp, axis=1, keepdims=True))
    fp_n = fp / jnp.maximum(norm, 1e-12)

    if fingerprints.dtype == jnp.bfloat16 or use_bf16_matmul:
        compute_dtype = jnp.bfloat16       # MXU-native rate on v5e/v6e/v7x
    else:
        compute_dtype = jnp.float32        # default: keeps 1e-4 accuracy
    itemsize = jnp.dtype(compute_dtype).itemsize

    b_pad, d_pad, tile, vmem_limit = _choose_tiles(b, d, itemsize, block_size)
    n_pad = b_pad - b
    n_row = b_pad // tile

    fp_row = jnp.pad((fp_n * inv_temp).astype(compute_dtype),
                     ((0, n_pad), (0, d_pad - d)))
    fp_col = jnp.pad(fp_n.astype(compute_dtype), ((0, n_pad), (0, d_pad - d)))

    lab = labels.astype(jnp.int32)
    if n_pad > 0:
        # Sentinel that cannot collide with a real label unless the label set
        # contains both INT32_MAX and INT32_MIN (review correctness note).
        lab_max = jnp.max(lab)
        sentinel = jnp.where(lab_max < jnp.iinfo(jnp.int32).max,
                             lab_max + 1, jnp.min(lab) - 1)
        lab = jnp.concatenate(
            [lab, jnp.broadcast_to(sentinel, (n_pad,)).astype(jnp.int32)])
    lab_col = lab.reshape(b_pad, 1)        # row-block labels (sublane vector)
    lab_row = lab.reshape(1, b_pad)        # column-block labels (lane-dense)

    kernel = functools.partial(
        _infonce_kernel,
        b_actual=b, n_pad=n_pad, tile_m=tile, tile_n=tile,
        class_balance=CLASS_BALANCE, epsilon=EPSILON, max_margin=MAX_MARGIN)

    grid = (n_row, n_row)
    partials = pl.pallas_call(
        kernel,
        out_shape=jax.ShapeDtypeStruct((n_row * 8, 128), jnp.float32),
        grid_spec=pltpu.PrefetchScalarGridSpec(
            num_scalar_prefetch=0,
            grid=grid,
            in_specs=[
                pl.BlockSpec((tile, d_pad), lambda i, k: (i, 0)),   # row fp tile
                pl.BlockSpec((tile, d_pad), lambda i, k: (k, 0)),   # col fp tile
                pl.BlockSpec((tile, 1), lambda i, k: (i, 0)),       # row labels
                pl.BlockSpec((1, tile), lambda i, k: (0, k)),       # col labels
            ],
            out_specs=pl.BlockSpec((8, 128), lambda i, k: (i, 0)),  # per-row-block
            scratch_shapes=[
                pltpu.VMEM((tile, 1), jnp.float32),   # positive-sum accumulator
                pltpu.VMEM((tile, 1), jnp.float32),   # row-sum accumulator
                pltpu.VMEM((tile, 1), jnp.float32),   # class-count accumulator
            ],
        ),
        compiler_params=pltpu.CompilerParams(
            # Axis 0 (row blocks) is independent -> megacore-shardable on v7x.
            # Axis 1 carries per-row accumulator state -> arbitrary.
            dimension_semantics=("parallel", "arbitrary"),
            vmem_limit_bytes=vmem_limit,
        ),
        cost_estimate=pl.CostEstimate(
            flops=2 * b_pad * b_pad * d_pad,
            transcendentals=b_pad * b_pad,
            # fp_col is re-streamed once per row block.
            bytes_accessed=(1 + n_row) * b_pad * d_pad * itemsize
            + (1 + n_row) * b_pad * 4 + n_row * 8 * 128 * 4,
        ),
    )(fp_row, fp_col, lab_col, lab_row)

    # ---- tiny cross-row-block reduction + final scalar math in plain JAX ----
    parts = partials.reshape(n_row, 8, 128)[:, 0, :4]
    sums = jnp.sum(parts, axis=0)
    acc_qnz, acc_nz, acc_r, acc_q = sums[0], sums[1], sums[2], sums[3]
    # class_weight_i = (1/count_i) * B / sum_j(1/count_j); formulas reduce to the
    # unweighted ones when class_balance=False (r == 1, acc_r == B).
    loss_sel = (jnp.float32(b) / acc_r) * acc_qnz / acc_nz
    loss_mean = acc_q / acc_r
    return jnp.where(acc_nz > 0.0, loss_sel, loss_mean)


def _reference(fingerprints, labels):
    """Pure-JAX reference mirroring the PyTorch forward (default config)."""
    fp = fingerprints.astype(jnp.float32)
    norm = jnp.sqrt(jnp.sum(fp * fp, axis=1, keepdims=True))
    fp_n = fp / jnp.maximum(norm, 1e-12)
    sim = jnp.clip(fp_n @ fp_n.T / TEMPERATURE, -MAX_MARGIN, MAX_MARGIN)
    lbl = labels.reshape(-1, 1)
    eq = (lbl == lbl.T).astype(jnp.float32)
    b = fp.shape[0]
    off_diag = 1.0 - jnp.eye(b, dtype=jnp.float32)
    pos_mask = eq * off_diag
    neg_mask = (1.0 - eq) * off_diag
    exp_sim = jnp.exp(sim)
    pos_sim = jnp.sum(exp_sim * pos_mask, axis=1)
    neg_sim = jnp.sum(exp_sim * neg_mask, axis=1)
    loss = -jnp.log(pos_sim / (pos_sim + neg_sim + EPSILON))
    if CLASS_BALANCE:
        counts = jnp.sum(eq, axis=1)
        cw = 1.0 / counts
        cw = cw / jnp.sum(cw) * b
        loss = loss * cw
    non_zero = (pos_sim > 0).astype(jnp.float32)
    return jnp.where(
        jnp.sum(non_zero) > 0,
        jnp.sum(loss * non_zero) / jnp.sum(non_zero),
        jnp.mean(loss),
    )


if __name__ == "__main__":
    key = jax.random.PRNGKey(0)
    k1, k2 = jax.random.split(key)

    # Case 1: tiny batch (single lane-dense tile; exercises B/D padding + sentinel).
    b1, d1 = 10, 32
    fp1 = jax.random.normal(k1, (b1, d1), dtype=jnp.float32)
    lbl1 = jnp.array([0, 0, 1, 1, 2, 2, 3, 3, 4, 4], dtype=jnp.int32)
    loss1 = jax.block_until_ready(advanced_infonce_loss(fp1, lbl1))
    ref1 = _reference(fp1, lbl1)
    assert jnp.isfinite(loss1), "loss1 is not finite"
    assert jnp.allclose(loss1, ref1, rtol=1e-4, atol=1e-4), (loss1, ref1)

    # Case 2: forces a 2x2 block grid (multi-block accumulation + diagonal blocks
    # + per-row-block partial outputs reduced in JAX).
    b2, d2 = 200, 32
    fp2 = jax.random.normal(k2, (b2, d2), dtype=jnp.float32)
    lbl2 = jnp.arange(b2, dtype=jnp.int32) % 50
    loss2 = jax.block_until_ready(advanced_infonce_loss(fp2, lbl2, block_size=128))
    ref2 = _reference(fp2, lbl2)
    assert jnp.isfinite(loss2), "loss2 is not finite"
    assert jnp.allclose(loss2, ref2, rtol=1e-4, atol=1e-4), (loss2, ref2)

    # Case 3: default (auto) tile selection on the same data as case 2.
    loss3 = jax.block_until_ready(advanced_infonce_loss(fp2, lbl2))
    assert jnp.allclose(loss3, ref2, rtol=1e-4, atol=1e-4), (loss3, ref2)

    print("KERNEL_OK")
</pallas_src>

<mosaic_0001>
module attributes {stable_mosaic.version = 11 : i64} {
  func.func @_infonce_kernel(%arg0: i32, %arg1: i32, %arg2: memref<128x128xf32, #tpu.memory_space<vmem>>, %arg3: memref<128x128xf32, #tpu.memory_space<vmem>>, %arg4: memref<128x1xi32, #tpu.memory_space<vmem>>, %arg5: memref<1x128xi32, #tpu.memory_space<vmem>>, %arg6: memref<8x128xf32, #tpu.memory_space<vmem>>, %arg7: memref<128x1xf32, #tpu.memory_space<vmem>>, %arg8: memref<128x1xf32, #tpu.memory_space<vmem>>, %arg9: memref<128x1xf32, #tpu.memory_space<vmem>>) attributes {dimension_semantics = [#tpu.dimension_semantics<parallel>, #tpu.dimension_semantics<arbitrary>], iteration_bounds = array<i64: 1, 1>, scalar_prefetch = 0 : i64, scratch_operands = 3 : i64, tpu.core_type = #tpu.core_type<tc>, window_params = [{transform_indices = @transform_0, window_bounds = array<i64: 128, 128>}, {transform_indices = @transform_1, window_bounds = array<i64: 128, 128>}, {transform_indices = @transform_2, window_bounds = array<i64: 128, 1>}, {transform_indices = @transform_3, window_bounds = array<i64: 1, 128>}, {transform_indices = @transform_4, window_bounds = array<i64: 8, 128>}]} {
    %c0_i32 = arith.constant 0 : i32
    %0 = arith.cmpi eq, %arg1, %c0_i32 : i32
    %1 = arith.extui %0 : i1 to i32
    %c0_i32_0 = arith.constant 0 : i32
    %2 = arith.cmpi ne, %1, %c0_i32_0 : i32
    scf.if %2 {
      %cst_19 = arith.constant 0.000000e+00 : f32
      %32 = vector.broadcast %cst_19 : f32 to vector<128x1xf32>
      %c0_20 = arith.constant 0 : index
      %c0_21 = arith.constant 0 : index
      %33 = vector.load %arg7[%c0_20, %c0_21] : memref<128x1xf32, #tpu.memory_space<vmem>>, vector<128x1xf32>
      tpu.vector_store %arg7[%c0_20, %c0_21], %32 {strides = array<i32>} : memref<128x1xf32, #tpu.memory_space<vmem>>, vector<128x1xf32>,
      %cst_22 = arith.constant 0.000000e+00 : f32
      %34 = vector.broadcast %cst_22 : f32 to vector<128x1xf32>
      %c0_23 = arith.constant 0 : index
      %c0_24 = arith.constant 0 : index
      %35 = vector.load %arg8[%c0_23, %c0_24] : memref<128x1xf32, #tpu.memory_space<vmem>>, vector<128x1xf32>
      tpu.vector_store %arg8[%c0_23, %c0_24], %34 {strides = array<i32>} : memref<128x1xf32, #tpu.memory_space<vmem>>, vector<128x1xf32>,
      %cst_25 = arith.constant 0.000000e+00 : f32
      %36 = vector.broadcast %cst_25 : f32 to vector<128x1xf32>
      %c0_26 = arith.constant 0 : index
      %c0_27 = arith.constant 0 : index
      %37 = vector.load %arg9[%c0_26, %c0_27] : memref<128x1xf32, #tpu.memory_space<vmem>>, vector<128x1xf32>
      tpu.vector_store %arg9[%c0_26, %c0_27], %36 {strides = array<i32>} : memref<128x1xf32, #tpu.memory_space<vmem>>, vector<128x1xf32>,
    } else {
    }
    %c0 = arith.constant 0 : index
    %c0_1 = arith.constant 0 : index
    %3 = vector.load %arg2[%c0, %c0_1] : memref<128x128xf32, #tpu.memory_space<vmem>>, vector<128x128xf32>
    %c0_2 = arith.constant 0 : index
    %c0_3 = arith.constant 0 : index
    %4 = vector.load %arg3[%c0_2, %c0_3] : memref<128x128xf32, #tpu.memory_space<vmem>>, vector<128x128xf32>
    %cst = arith.constant dense<0.000000e+00> : vector<128x128xf32>
    %5 = tpu.matmul %3, %4, %cst {dimension_numbers = #tpu.dot_dimension_numbers<[1], [1], [0], [0], [0, 0, 1, 0], [], []>} : vector<128x128xf32>, vector<128x128xf32>, vector<128x128xf32> -> vector<128x128xf32>
    %cst_4 = arith.constant -1.000000e+01 : f32
    %cst_5 = arith.constant 1.000000e+01 : f32
    %6 = vector.broadcast %cst_4 : f32 to vector<128x128xf32>
    %7 = arith.maximumf %6, %5 : vector<128x128xf32>
    %8 = vector.broadcast %cst_5 : f32 to vector<128x128xf32>
    %9 = arith.minimumf %8, %7 : vector<128x128xf32>
    %10 = math.exp %9 : vector<128x128xf32>
    %c0_6 = arith.constant 0 : index
    %c0_7 = arith.constant 0 : index
    %11 = vector.load %arg4[%c0_6, %c0_7] : memref<128x1xi32, #tpu.memory_space<vmem>>, vector<128x1xi32>
    %c0_8 = arith.constant 0 : index
    %c0_9 = arith.constant 0 : index
    %12 = vector.load %arg5[%c0_8, %c0_9] : memref<1x128xi32, #tpu.memory_space<vmem>>, vector<1x128xi32>
    %13 = vector.broadcast %11 : vector<128x1xi32> to vector<128x128xi32>
    %14 = vector.broadcast %12 : vector<1x128xi32> to vector<128x128xi32>
    %15 = arith.cmpi eq, %13, %14 : vector<128x128xi32>
    %16 = arith.extui %15 : vector<128x128xi1> to vector<128x128xi32>
    %17 = arith.sitofp %16 : vector<128x128xi32> to vector<128x128xf32>
    %c0_10 = arith.constant 0 : index
    %c0_11 = arith.constant 0 : index
    %18 = vector.load %arg9[%c0_10, %c0_11] : memref<128x1xf32, #tpu.memory_space<vmem>>, vector<128x1xf32>
    %cst_12 = arith.constant dense<0.000000e+00> : vector<128xf32>
    %19 = vector.multi_reduction <add>, %17, %cst_12 [1] : vector<128x128xf32> to vector<128xf32>
    %20 = vector.shape_cast %19 : vector<128xf32> to vector<128x1xf32>
    %21 = arith.addf %18, %20 : vector<128x1xf32>
    %c0_13 = arith.constant 0 : index
    %c0_14 = arith.constant 0 : index
    %22 = vector.load %arg9[%c0_13, %c0_14] : memref<128x1xf32, #tpu.memory_space<vmem>>, vector<128x1xf32>
    tpu.vector_store %arg9[%c0_13, %c0_14], %21 {strides = array<i32>} : memref<128x1xf32, #tpu.memory_space<vmem>>, vector<128x1xf32>,
    %23 = arith.cmpi ne, %arg0, %arg1 : i32
    %24 = arith.extui %23 : i1 to i32
    %c0_i32_15 = arith.constant 0 : i32
    %25 = arith.cmpi ne, %24, %c0_i32_15 : i32
    scf.if %25 {
      %c0_19 = arith.constant 0 : index
      %c0_20 = arith.constant 0 : index
      %32 = vector.load %arg7[%c0_19, %c0_20] : memref<128x1xf32, #tpu.memory_space<vmem>>, vector<128x1xf32>
      %33 = arith.mulf %10, %17 : vector<128x128xf32>
      %cst_21 = arith.constant dense<0.000000e+00> : vector<128xf32>
      %34 = vector.multi_reduction <add>, %33, %cst_21 [1] : vector<128x128xf32> to vector<128xf32>
      %35 = vector.shape_cast %34 : vector<128xf32> to vector<128x1xf32>
      %36 = arith.addf %32, %35 : vector<128x1xf32>
      %c0_22 = arith.constant 0 : index
      %c0_23 = arith.constant 0 : index
      %37 = vector.load %arg7[%c0_22, %c0_23] : memref<128x1xf32, #tpu.memory_space<vmem>>, vector<128x1xf32>
      tpu.vector_store %arg7[%c0_22, %c0_23], %36 {strides = array<i32>} : memref<128x1xf32, #tpu.memory_space<vmem>>, vector<128x1xf32>,
      %c0_24 = arith.constant 0 : index
      %c0_25 = arith.constant 0 : index
      %38 = vector.load %arg8[%c0_24, %c0_25] : memref<128x1xf32, #tpu.memory_space<vmem>>, vector<128x1xf32>
      %cst_26 = arith.constant dense<0.000000e+00> : vector<128xf32>
      %39 = vector.multi_reduction <add>, %10, %cst_26 [1] : vector<128x128xf32> to vector<128xf32>
      %40 = vector.shape_cast %39 : vector<128xf32> to vector<128x1xf32>
      %41 = arith.addf %38, %40 : vector<128x1xf32>
      %c0_27 = arith.constant 0 : index
      %c0_28 = arith.constant 0 : index
      %42 = vector.load %arg8[%c0_27, %c0_28] : memref<128x1xf32, #tpu.memory_space<vmem>>, vector<128x1xf32>
      tpu.vector_store %arg8[%c0_27, %c0_28], %41 {strides = array<i32>} : memref<128x1xf32, #tpu.memory_space<vmem>>, vector<128x1xf32>,
    } else {
    }
    %26 = arith.cmpi eq, %arg0, %arg1 : i32
    %27 = arith.extui %26 : i1 to i32
    %c0_i32_16 = arith.constant 0 : i32
    %28 = arith.cmpi ne, %27, %c0_i32_16 : i32
    scf.if %28 {
      %32 = tpu.iota {dimensions = array<i32: 0>} : vector<128x128xi32>
      %33 = tpu.iota {dimensions = array<i32: 1>} : vector<128x128xi32>
      %34 = arith.cmpi eq, %32, %33 : vector<128x128xi32>
      %cst_19 = arith.constant 0.000000e+00 : f32
      %35 = vector.broadcast %cst_19 : f32 to vector<128x128xf32>
      %36 = arith.select %34, %35, %10 : vector<128x128xi1>, vector<128x128xf32>
      %c0_20 = arith.constant 0 : index
      %c0_21 = arith.constant 0 : index
      %37 = vector.load %arg7[%c0_20, %c0_21] : memref<128x1xf32, #tpu.memory_space<vmem>>, vector<128x1xf32>
      %38 = arith.mulf %36, %17 : vector<128x128xf32>
      %cst_22 = arith.constant dense<0.000000e+00> : vector<128xf32>
      %39 = vector.multi_reduction <add>, %38, %cst_22 [1] : vector<128x128xf32> to vector<128xf32>
      %40 = vector.shape_cast %39 : vector<128xf32> to vector<128x1xf32>
      %41 = arith.addf %37, %40 : vector<128x1xf32>
      %c0_23 = arith.constant 0 : index
      %c0_24 = arith.constant 0 : index
      %42 = vector.load %arg7[%c0_23, %c0_24] : memref<128x1xf32, #tpu.memory_space<vmem>>, vector<128x1xf32>
      tpu.vector_store %arg7[%c0_23, %c0_24], %41 {strides = array<i32>} : memref<128x1xf32, #tpu.memory_space<vmem>>, vector<128x1xf32>,
      %c0_25 = arith.constant 0 : index
      %c0_26 = arith.constant 0 : index
      %43 = vector.load %arg8[%c0_25, %c0_26] : memref<128x1xf32, #tpu.memory_space<vmem>>, vector<128x1xf32>
      %cst_27 = arith.constant dense<0.000000e+00> : vector<128xf32>
      %44 = vector.multi_reduction <add>, %36, %cst_27 [1] : vector<128x128xf32> to vector<128xf32>
      %45 = vector.shape_cast %44 : vector<128xf32> to vector<128x1xf32>
      %46 = arith.addf %43, %45 : vector<128x1xf32>
      %c0_28 = arith.constant 0 : index
      %c0_29 = arith.constant 0 : index
      %47 = vector.load %arg8[%c0_28, %c0_29] : memref<128x1xf32, #tpu.memory_space<vmem>>, vector<128x1xf32>
      tpu.vector_store %arg8[%c0_28, %c0_29], %46 {strides = array<i32>} : memref<128x1xf32, #tpu.memory_space<vmem>>, vector<128x1xf32>,
    } else {
    }
    %c0_i32_17 = arith.constant 0 : i32
    %29 = arith.cmpi eq, %arg1, %c0_i32_17 : i32
    %30 = arith.extui %29 : i1 to i32
    %c0_i32_18 = arith.constant 0 : i32
    %31 = arith.cmpi ne, %30, %c0_i32_18 : i32
    scf.if %31 {
      %c0_19 = arith.constant 0 : index
      %c0_20 = arith.constant 0 : index
      %32 = vector.load %arg7[%c0_19, %c0_20] : memref<128x1xf32, #tpu.memory_space<vmem>>, vector<128x1xf32>
      %c0_21 = arith.constant 0 : index
      %c0_22 = arith.constant 0 : index
      %33 = vector.load %arg8[%c0_21, %c0_22] : memref<128x1xf32, #tpu.memory_space<vmem>>, vector<128x1xf32>
      %cst_23 = arith.constant 1.180000e+02 : f32
      %34 = vector.broadcast %cst_23 : f32 to vector<128x1xf32>
      %35 = arith.subf %33, %34 : vector<128x1xf32>
      %36 = arith.subf %35, %32 : vector<128x1xf32>
      %c0_24 = arith.constant 0 : index
      %c0_25 = arith.constant 0 : index
      %37 = vector.load %arg9[%c0_24, %c0_25] : memref<128x1xf32, #tpu.memory_space<vmem>>, vector<128x1xf32>
      %38 = arith.addf %32, %36 : vector<128x1xf32>
      %cst_26 = arith.constant 9.99999993E-9 : f32
      %39 = vector.broadcast %cst_26 : f32 to vector<128x1xf32>
      %40 = arith.addf %38, %39 : vector<128x1xf32>
      %41 = arith.divf %32, %40 : vector<128x1xf32>
      %42 = math.log %41 : vector<128x1xf32>
      %cst_27 = arith.constant 0.000000e+00 : f32
      %43 = vector.broadcast %cst_27 : f32 to vector<128x1xf32>
      %44 = arith.subf %43, %42 : vector<128x1xf32>
      %cst_28 = arith.constant 1.000000e+00 : f32
      %45 = vector.broadcast %cst_28 : f32 to vector<128x1xf32>
      %46 = arith.divf %45, %37 : vector<128x1xf32>
      %47 = arith.mulf %44, %46 : vector<128x1xf32>
      %cst_29 = arith.constant 0.000000e+00 : f32
      %48 = vector.broadcast %cst_29 : f32 to vector<128x1xf32>
      %49 = arith.cmpf ogt, %32, %48 : vector<128x1xf32>
      %50 = arith.extui %49 : vector<128x1xi1> to vector<128x1xi32>
      %51 = arith.sitofp %50 : vector<128x1xi32> to vector<128x1xf32>
      %c128_i32 = arith.constant 128 : i32
      %52 = arith.muli %arg0, %c128_i32 : i32
      %53 = tpu.iota {dimensions = array<i32: 0>} : vector<128x1xi32>
      %54 = vector.broadcast %52 : i32 to vector<128x1xi32>
      %55 = arith.addi %54, %53 : vector<128x1xi32>
      %c10_i32 = arith.constant 10 : i32
      %56 = vector.broadcast %c10_i32 : i32 to vector<128x1xi32>
      %57 = arith.cmpi slt, %55, %56 : vector<128x1xi32>
      %cst_30 = arith.constant 0.000000e+00 : f32
      %58 = vector.broadcast %cst_30 : f32 to vector<128x1xf32>
      %59 = arith.mulf %47, %51 : vector<128x1xf32>
      %60 = arith.select %57, %59, %58 : vector<128x1xi1>, vector<128x1xf32>
      %61 = vector.shape_cast %60 : vector<128x1xf32> to vector<1x128x1xf32>
      %cst_31 = arith.constant dense<0.000000e+00> : vector<1xf32>
      %62 = vector.multi_reduction <add>, %61, %cst_31 [1, 2] : vector<1x128x1xf32> to vector<1xf32>
      %63 = vector.shape_cast %62 : vector<1xf32> to vector<1x1x1xf32>
      %64 = vector.extract %63[0, 0, 0] : f32 from vector<1x1x1xf32>
      %65 = arith.select %57, %51, %58 : vector<128x1xi1>, vector<128x1xf32>
      %66 = vector.shape_cast %65 : vector<128x1xf32> to vector<1x128x1xf32>
      %cst_32 = arith.constant dense<0.000000e+00> : vector<1xf32>
      %67 = vector.multi_reduction <add>, %66, %cst_32 [1, 2] : vector<1x128x1xf32> to vector<1xf32>
      %68 = vector.shape_cast %67 : vector<1xf32> to vector<1x1x1xf32>
      %69 = vector.extract %68[0, 0, 0] : f32 from vector<1x1x1xf32>
      %70 = arith.select %57, %46, %58 : vector<128x1xi1>, vector<128x1xf32>
      %71 = vector.shape_cast %70 : vector<128x1xf32> to vector<1x128x1xf32>
      %cst_33 = arith.constant dense<0.000000e+00> : vector<1xf32>
      %72 = vector.multi_reduction <add>, %71, %cst_33 [1, 2] : vector<1x128x1xf32> to vector<1xf32>
      %73 = vector.shape_cast %72 : vector<1xf32> to vector<1x1x1xf32>
      %74 = vector.extract %73[0, 0, 0] : f32 from vector<1x1x1xf32>
      %75 = arith.select %57, %47, %58 : vector<128x1xi1>, vector<128x1xf32>
      %76 = vector.shape_cast %75 : vector<128x1xf32> to vector<1x128x1xf32>
      %cst_34 = arith.constant dense<0.000000e+00> : vector<1xf32>
      %77 = vector.multi_reduction <add>, %76, %cst_34 [1, 2] : vector<1x128x1xf32> to vector<1xf32>
      %78 = vector.shape_cast %77 : vector<1xf32> to vector<1x1x1xf32>
      %79 = vector.extract %78[0, 0, 0] : f32 from vector<1x1x1xf32>
      %80 = tpu.iota {dimensions = array<i32: 0>} : vector<8x128xi32>
      %81 = tpu.iota {dimensions = array<i32: 1>} : vector<8x128xi32>
      %c0_i32_35 = arith.constant 0 : i32
      %82 = vector.broadcast %c0_i32_35 : i32 to vector<8x128xi32>
      %83 = arith.cmpi eq, %80, %82 : vector<8x128xi32>
      %c0_i32_36 = arith.constant 0 : i32
      %84 = vector.broadcast %c0_i32_36 : i32 to vector<8x128xi32>
      %85 = arith.cmpi eq, %81, %84 : vector<8x128xi32>
      %86 = arith.andi %83, %85 : vector<8x128xi1>
      %cst_37 = arith.constant 0.000000e+00 : f32
      %87 = vector.broadcast %64 : f32 to vector<8x128xf32>
      %88 = vector.broadcast %cst_37 : f32 to vector<8x128xf32>
      %89 = arith.select %86, %87, %88 : vector<8x128xi1>, vector<8x128xf32>
      %c0_i32_38 = arith.constant 0 : i32
      %90 = vector.broadcast %c0_i32_38 : i32 to vector<8x128xi32>
      %91 = arith.cmpi eq, %80, %90 : vector<8x128xi32>
      %c1_i32 = arith.constant 1 : i32
      %92 = vector.broadcast %c1_i32 : i32 to vector<8x128xi32>
      %93 = arith.cmpi eq, %81, %92 : vector<8x128xi32>
      %94 = arith.andi %91, %93 : vector<8x128xi1>
      %95 = vector.broadcast %69 : f32 to vector<8x128xf32>
      %96 = arith.select %94, %95, %89 : vector<8x128xi1>, vector<8x128xf32>
      %c0_i32_39 = arith.constant 0 : i32
      %97 = vector.broadcast %c0_i32_39 : i32 to vector<8x128xi32>
      %98 = arith.cmpi eq, %80, %97 : vector<8x128xi32>
      %c2_i32 = arith.constant 2 : i32
      %99 = vector.broadcast %c2_i32 : i32 to vector<8x128xi32>
      %100 = arith.cmpi eq, %81, %99 : vector<8x128xi32>
      %101 = arith.andi %98, %100 : vector<8x128xi1>
      %102 = vector.broadcast %74 : f32 to vector<8x128xf32>
      %103 = arith.select %101, %102, %96 : vector<8x128xi1>, vector<8x128xf32>
      %c0_i32_40 = arith.constant 0 : i32
      %104 = vector.broadcast %c0_i32_40 : i32 to vector<8x128xi32>
      %105 = arith.cmpi eq, %80, %104 : vector<8x128xi32>
      %c3_i32 = arith.constant 3 : i32
      %106 = vector.broadcast %c3_i32 : i32 to vector<8x128xi32>
      %107 = arith.cmpi eq, %81, %106 : vector<8x128xi32>
      %108 = arith.andi %105, %107 : vector<8x128xi1>
      %109 = vector.broadcast %79 : f32 to vector<8x128xf32>
      %110 = arith.select %108, %109, %103 : vector<8x128xi1>, vector<8x128xf32>
      %c0_41 = arith.constant 0 : index
      %c0_42 = arith.constant 0 : index
      %111 = vector.load %arg6[%c0_41, %c0_42] : memref<8x128xf32, #tpu.memory_space<vmem>>, vector<8x128xf32>
      tpu.vector_store %arg6[%c0_41, %c0_42], %110 {strides = array<i32>} : memref<8x128xf32, #tpu.memory_space<vmem>>, vector<8x128xf32>,
    } else {
    }
    return
  }
  func.func @transform_0(%arg0: i32, %arg1: i32) -> (i32, i32) {
    %c0_i32 = arith.constant 0 : i32
    %c0_i32_0 = arith.constant 0 : i32
    return %arg0, %c0_i32 : i32, i32
  }
  func.func @transform_1(%arg0: i32, %arg1: i32) -> (i32, i32) {
    %c0_i32 = arith.constant 0 : i32
    %c0_i32_0 = arith.constant 0 : i32
    return %arg1, %c0_i32 : i32, i32
  }
  func.func @transform_2(%arg0: i32, %arg1: i32) -> (i32, i32) {
    %c0_i32 = arith.constant 0 : i32
    %c0_i32_0 = arith.constant 0 : i32
    return %arg0, %c0_i32 : i32, i32
  }
  func.func @transform_3(%arg0: i32, %arg1: i32) -> (i32, i32) {
    %c0_i32 = arith.constant 0 : i32
    %c0_i32_0 = arith.constant 0 : i32
    return %c0_i32, %arg1 : i32, i32
  }
  func.func @transform_4(%arg0: i32, %arg1: i32) -> (i32, i32) {
    %c0_i32 = arith.constant 0 : i32
    %c0_i32_0 = arith.constant 0 : i32
    return %arg0, %c0_i32 : i32, i32
  }
}

</mosaic_0001>

<bundles_post_ra>
// kernel: advanced_infonce_loss.1
= control target key start
LH: loop header
LB: loop body
LE: loop exit
PB: predicated region body
PF: predicated region fallthrough
CT: control target
= control target key end

     0   :  { %9 = vsyncpa [#allocation6], 0  ;;  %s2454_s0 = inlined_call_operand.hbm [shape: f32[128,128], index: 0, kind: input, shape index: {}]   ;;  %s2455_s1 = inlined_call_operand.hbm [shape: f32[128,128], index: 1, kind: input, shape index: {}]   ;;  %s2456_s2 = inlined_call_operand.hbm [shape: s32[128,1], index: 2, kind: input, shape index: {}]   ;;  %s2457_s3 = inlined_call_operand.hbm [shape: s32[1,128], index: 3, kind: input, shape index: {}]   ;;  %s2458_s4 = inlined_call_operand.hbm [shape: f32[8,128], index: 4, kind: output, shape index: {}]  }
   0x1   :  { %10 = vsyncpa [#allocation9], 0 }
   0x2   :  { %11 = vsyncpa [#allocation12], 0 }
   0x3   :  { %12 = vsyncpa [#allocation7], 0  ;;  %s1975_s15 = smov [#allocation8]   ;;  %s1976_s17 = smov [#allocation5]  }
   0x4   :  { %s30_s16 = sshll.u32 %s1975_s15, 4  ;;  %s18_s18 = sshll.u32 %s1976_s17, 4  ;;  %s31_s16 = int_to_ptr.vmem [resolvable:$true] %s30_s16  ;;  %s2009_s18 = int_to_ptr.vmem [resolvable:$true] %s18_s18 }
   0x5   :  { %s1857_s21 = scalar_lea.hbm %s2455_s1, 2048 }
   0x6   :  { %p1858_p0 = scmp.ne.s32.totalorder %s2455_s1, %s1857_s21  ;;  %p1861_p1 = scmp.lt.u32.totalorder %s1857_s21, %s2455_s1 }
   0x8   :  { %p1863_p2 = pnand %p1861_p1, %p1858_p0 }
   0xa   :  { %1866 = shalt.err (!%p1863_p2)
}
   0xb   :  { %s1867_s26 = scalar_lea.vmem %s31_s16, 2048  ;;  %p1872_p4 = scmp.lt.s32.totalorder %s31_s16, %s31_s16 }
   0xc   :  { %p1868_p3 = scmp.ne.s32.totalorder %s31_s16, %s1867_s26  ;;  %p1873_p5 = scmp.lt.s32.totalorder %s1867_s26, %s1867_s26 }
   0xe   :  { %p1874_p6 = por %p1873_p5, %p1872_p4 }
  0x10   :  { %p1875_p7 = pnand %p1874_p6, %p1868_p3 }
  0x12   :  { %1878 = shalt.err (!%p1875_p7)
}
  0x13   :  { %s1977_s27 = smov 128   ;;  %s1978_s28 = smov 8  }
  0x14   :  { %36 = dma.hbm_to_vmem [thread:$0]  %s2455_s1, 2048, %s31_s16, [#allocation9], %s1977_s27, %s1977_s27, %s1978_s28  }
  0x15   :  { %s1879_s7 = scalar_lea.hbm %s2454_s0, 2048 }
  0x16   :  { %p1880_p8 = scmp.ne.s32.totalorder %s2454_s0, %s1879_s7  ;;  %p1883_p9 = scmp.lt.u32.totalorder %s1879_s7, %s2454_s0 }
  0x18   :  { %p1885_p10 = pnand %p1883_p9, %p1880_p8 }
  0x1a   :  { %1888 = shalt.err (!%p1885_p10)
}
  0x1b   :  { %s1889_s12 = scalar_lea.vmem %s2009_s18, 2048  ;;  %p1894_p12 = scmp.lt.s32.totalorder %s2009_s18, %s2009_s18 }
  0x1c   :  { %p1890_p11 = scmp.ne.s32.totalorder %s2009_s18, %s1889_s12  ;;  %p1895_p13 = scmp.lt.s32.totalorder %s1889_s12, %s1889_s12 }
  0x1e   :  { %p1896_p0 = por %p1895_p13, %p1894_p12 }
  0x20   :  { %p1897_p1 = pnand %p1896_p0, %p1890_p11 }
  0x22   :  { %1900 = shalt.err (!%p1897_p1)
}
  0x23   :  { %24 = dma.hbm_to_vmem [thread:$0]  %s2454_s0, 2048, %s2009_s18, [#allocation6], %s1977_s27, %s1977_s27, %s1978_s28  }
  0x24   :  { %s1979_s14 = smov [#allocation10]   ;;  %s1980_s16 = smov [#allocation11]  }
  0x25   :  { %s42_s15 = sshll.u32 %s1979_s14, 4  ;;  %s55_s17 = sshll.u32 %s1980_s16, 4  ;;  %s43_s15 = int_to_ptr.vmem [resolvable:$true] %s42_s15  ;;  %s56_s17 = int_to_ptr.vmem [resolvable:$true] %s55_s17 }
  0x26   :  { %s1901_s21 = scalar_lea.hbm %s2456_s2, 2048 }
  0x27   :  { %p1902_p2 = scmp.ne.s32.totalorder %s2456_s2, %s1901_s21  ;;  %p1905_p3 = scmp.lt.u32.totalorder %s1901_s21, %s2456_s2 }
  0x29   :  { %p1907_p4 = pnand %p1905_p3, %p1902_p2 }
  0x2b   :  { %1910 = shalt.err (!%p1907_p4)
}
  0x2c   :  { %s1911_s0 = scalar_lea.vmem %s43_s15, 2048  ;;  %p1916_p6 = scmp.lt.s32.totalorder %s43_s15, %s43_s15 }
  0x2d   :  { %p1912_p5 = scmp.ne.s32.totalorder %s43_s15, %s1911_s0  ;;  %p1917_p7 = scmp.lt.s32.totalorder %s1911_s0, %s1911_s0 }
  0x2f   :  { %p1918_p8 = por %p1917_p7, %p1916_p6 }
  0x31   :  { %p1919_p9 = pnand %p1918_p8, %p1912_p5 }
  0x33   :  { %1922 = shalt.err (!%p1919_p9)
}
  0x34   :  { %48 = dma.hbm_to_vmem [thread:$0]  %s2456_s2, 2048, %s43_s15, [#allocation9], %s1977_s27, %s1977_s27, %s1978_s28  }
  0x35   :  { %s1923_s5 = scalar_lea.hbm %s2457_s3, 16 }
  0x36   :  { %p1924_p10 = scmp.ne.s32.totalorder %s2457_s3, %s1923_s5  ;;  %p1927_p11 = scmp.lt.u32.totalorder %s1923_s5, %s2457_s3 }
  0x38   :  { %p1929_p12 = pnand %p1927_p11, %p1924_p10 }
  0x3a   :  { %1932 = shalt.err (!%p1929_p12)
}
  0x3b   :  { %s1933_s10 = scalar_lea.vmem %s56_s17, 16  ;;  %s1937_s11 = scalar_lea.vmem %s56_s17, 32 }
  0x3c   :  { %p1934_p13 = scmp.ne.s32.totalorder %s56_s17, %s1933_s10  ;;  %p1938_p0 = scmp.lt.s32.totalorder %s56_s17, %s56_s17 }
  0x3d   :  { %p1939_p1 = scmp.lt.s32.totalorder %s1937_s11, %s1933_s10 }
  0x3f   :  { %p1940_p2 = por %p1939_p1, %p1938_p0 }
  0x41   :  { %p1941_p3 = pnand %p1940_p2, %p1934_p13 }
  0x43   :  { %1944 = shalt.err (!%p1941_p3)
}
  0x44   :  { %58 = dma.hbm_to_vmem [thread:$0]  %s2457_s3, 16, %s56_s17, [#allocation12]  }
  0x45   :  { %1967 = dma.done.wait [#allocation6], 2048  }
  0x46   :  { %1968 = vsyncadd [#allocation6], 4294965248 }
  0x47   :  { %1969 = dma.done.wait [#allocation9], 4096  }
  0x48   :  { %1970 = vsyncadd [#allocation9], 4294963200 }
  0x49   :  { %1971 = dma.done.wait [#allocation12], 16  }
  0x4a   :  { %1972 = vsyncadd [#allocation12], 4294967280  ;;  %v1981_v0 = vmov 0   ;;  %v140_v1 = vld [vmem:[#allocation8] sm:$0xff]  ;;  %v141_v2 = vld [vmem:[#allocation8 + $0x8] sm:$0xff]  ;;  %vm75_vm0 = vcmask 7168   ;;  %v747_v48 = vlaneseq }
  0x4b   :  { %1811 = vset.pattern.permute.xlu0 %v1981_v0  ;;  %1812 = vset.pattern.permute.xlu1 %v1981_v0  ;;  %v142_v3 = vld [vmem:[#allocation8 + $0x10] sm:$0xff]  ;;  %v1746_v4 = vpack.c.bf16 %v141_v2, %v140_v1  ;;  %v143_v5 = vld [vmem:[#allocation8 + $0x18] sm:$0xff]  ;;  %v124_v7 = vld [vmem:[#allocation5] sm:$0xff]  ;;  %v1982_v43 = vmov 0.0   ;;  %s1983_s12 = smov [#allocation13]  }
  0x4c   :  { %v1750_v6 = vpack.c.bf16 %v143_v5, %v142_v3  ;;  %v144_v8 = vld [vmem:[#allocation8 + $0x20] sm:$0xff]  ;;  %v145_v9 = vld [vmem:[#allocation8 + $0x28] sm:$0xff]  ;;  %1722 = vmatprep.mubr.f32.mxu0 %v124_v7  ;;  %v146_v14 = vld [vmem:[#allocation8 + $0x30] sm:$0xff]  ;;  %93 = vst.msk [vmem:[#allocation3 + $0x8] sm:$0xff] %vm75_vm0, %v1982_v43  ;;  %v2177_v55 = vshrl.u32 %v747_v48, 7  ;;  %v2190_v62 = vand.u32 127, %v747_v48 }
  0x4d   :  { %1747 = vmatprep.subr.bf16.mxu0 %v1746_v4  ;;  %1778 = vmatprep.subr.bf16.mxu1 %v1746_v4  ;;  %v366_v10 = vld [vmem:[#allocation10 + $0x8] sm:$0xff]  ;;  %v132_v11 = vld [vmem:[#allocation5 + $0x40] sm:$0xff]  ;;  %v1754_v13 = vpack.c.bf16 %v145_v9, %v144_v8  ;;  %v147_v15 = vld [vmem:[#allocation8 + $0x38] sm:$0xff]  ;;  %76 = vst.msk [vmem:[#allocation2] sm:$0xff] %vm75_vm0, %v1982_v43  ;;  %s1582_s1 = sshll.u32 %s1983_s12, 4  ;;  %s1583_s1 = int_to_ptr.vmem [resolvable:$true] %s1582_s1 }
  0x4e   :  { %1749 = vmatpush3.bf16.xpose.msra.mxu0 %v1746_v4  ;;  %1786 = vmatpush3.bf16.xpose.msra.mxu1 %v1746_v4  ;;  %v365_v12 = vld [vmem:[#allocation10] sm:$0xff]  ;;  %v1758_v16 = vpack.c.bf16 %v147_v15, %v146_v14  ;;  %v149_v18 = vld [vmem:[#allocation8 + $0x48] sm:$0xff]  ;;  %v150_v20 = vld [vmem:[#allocation8 + $0x50] sm:$0xff]  ;;  %77 = vst.msk [vmem:[#allocation2 + $0x8] sm:$0xff] %vm75_vm0, %v1982_v43  ;;  %v2188_v61 = vadd.s32 8, %v2177_v55  ;;  %vm766_vm4 = vcmp.eq.s32.totalorder %v2177_v55, %v2190_v62  ;;  %s1945_s15 = scalar_lea.vmem %s1583_s1, 128  ;;  %p1950_p5 = scmp.lt.s32.totalorder %s1583_s1, %s1583_s1 }
  0x4f   :  { %1751 = vmatprep.subr.bf16.mxu0 %v1750_v6  ;;  %1779 = vmatprep.subr.bf16.mxu1 %v1750_v6  ;;  %v148_v17 = vld [vmem:[#allocation8 + $0x40] sm:$0xff]  ;;  %v151_v21 = vld [vmem:[#allocation8 + $0x58] sm:$0xff]  ;;  %v153_v24 = vld [vmem:[#allocation8 + $0x68] sm:$0xff]  ;;  %78 = vst.msk [vmem:[#allocation2 + $0x10] sm:$0xff] %vm75_vm0, %v1982_v43  ;;  %p1946_p4 = scmp.ne.s32.totalorder %s1583_s1, %s1945_s15  ;;  %p1951_p6 = scmp.lt.s32.totalorder %s1945_s15, %s1945_s15 }
  0x50   :  { %386 = vperm.xlu0 %1811, %v366_v10   ;;  %1734 = vmatprep.mubr.f32.mxu1 %v132_v11  ;;  %v1762_v19 = vpack.c.bf16 %v149_v18, %v148_v17  ;;  %v1766_v22 = vpack.c.bf16 %v151_v21, %v150_v20  ;;  %v152_v23 = vld [vmem:[#allocation8 + $0x60] sm:$0xff]  ;;  %v154_v26 = vld [vmem:[#allocation8 + $0x70] sm:$0xff]  ;;  %v155_v27 = vld [vmem:[#allocation8 + $0x78] sm:$0xff]  ;;  %79 = vst.msk [vmem:[#allocation2 + $0x18] sm:$0xff] %vm75_vm0, %v1982_v43  ;;  %vm1301_vm13 = vcmp.lt.s32.totalorder %v2188_v61, 10 }
  0x51   :  { %v1770_v25 = vpack.c.bf16 %v153_v24, %v152_v23  ;;  %v1774_v28 = vpack.c.bf16 %v155_v27, %v154_v26  ;;  %v125_v29 = vld [vmem:[#allocation5 + $0x8] sm:$0xff]  ;;  %v126_v31 = vld [vmem:[#allocation5 + $0x10] sm:$0xff]  ;;  %v127_v33 = vld [vmem:[#allocation5 + $0x18] sm:$0xff]  ;;  %80 = vst.msk [vmem:[#allocation2 + $0x20] sm:$0xff] %vm75_vm0, %v1982_v43  ;;  %vm767_vm2 = vcmp.eq.s32.totalorder %v2188_v61, %v2190_v62  ;;  %v754_v61 = vadd.s32 48, %v2177_v55  ;;  %p1952_p7 = por %p1951_p6, %p1950_p5 }
  0x52   :  { %v133_v30 = vld [vmem:[#allocation5 + $0x48] sm:$0xff]  ;;  %v134_v32 = vld [vmem:[#allocation5 + $0x50] sm:$0xff]  ;;  %v135_v34 = vld [vmem:[#allocation5 + $0x58] sm:$0xff]  ;;  %81 = vst.msk [vmem:[#allocation2 + $0x28] sm:$0xff] %vm75_vm0, %v1982_v43 }
  0x53   :  { %v128_v35 = vld [vmem:[#allocation5 + $0x20] sm:$0xff]  ;;  %v129_v37 = vld [vmem:[#allocation5 + $0x28] sm:$0xff]  ;;  %v138_v39 = vld [vmem:[#allocation5 + $0x70] sm:$0xff]  ;;  %82 = vst.msk [vmem:[#allocation2 + $0x30] sm:$0xff] %vm75_vm0, %v1982_v43  ;;  %p1953_p8 = pnand %p1952_p7, %p1946_p4 }
  0x54   :  { %383 = vperm.xlu0 %1811, %v365_v12   ;;  %v136_v36 = vld [vmem:[#allocation5 + $0x60] sm:$0xff]  ;;  %v137_v38 = vld [vmem:[#allocation5 + $0x68] sm:$0xff]  ;;  %v130_v40 = vld [vmem:[#allocation5 + $0x30] sm:$0xff]  ;;  %83 = vst.msk [vmem:[#allocation2 + $0x38] sm:$0xff] %vm75_vm0, %v1982_v43 }
  0x55   :  { %v139_v41 = vld [vmem:[#allocation5 + $0x78] sm:$0xff]  ;;  %84 = vst.msk [vmem:[#allocation2 + $0x40] sm:$0xff] %vm75_vm0, %v1982_v43  ;;  %85 = vst.msk [vmem:[#allocation2 + $0x48] sm:$0xff] %vm75_vm0, %v1982_v43  ;;  %v2183_v58 = vld [vmem:[#allocation11] ss:$0 sm:$0xff] }
  0x56   :  { %1753 = vmatpush3.bf16.xpose.msra.mxu0 %v1750_v6  ;;  %1787 = vmatpush3.bf16.xpose.msra.mxu1 %v1750_v6  ;;  %v131_v42 = vld [vmem:[#allocation5 + $0x38] sm:$0xff]  ;;  %86 = vst.msk [vmem:[#allocation2 + $0x50] sm:$0xff] %vm75_vm0, %v1982_v43  ;;  %87 = vst.msk [vmem:[#allocation2 + $0x58] sm:$0xff] %vm75_vm0, %v1982_v43  ;;  %v369_v12 = vld [vmem:[#allocation10 + $0x20] sm:$0xff] }
  0x57   :  { %1755 = vmatprep.subr.bf16.mxu0 %v1754_v13  ;;  %1780 = vmatprep.subr.bf16.mxu1 %v1754_v13  ;;  %88 = vst.msk [vmem:[#allocation2 + $0x60] sm:$0xff] %vm75_vm0, %v1982_v43  ;;  %89 = vst.msk [vmem:[#allocation2 + $0x68] sm:$0xff] %vm75_vm0, %v1982_v43  ;;  %v375_v14 = vld [vmem:[#allocation10 + $0x50] sm:$0xff]  ;;  %v377_v15 = vld [vmem:[#allocation10 + $0x60] sm:$0xff] }
  0x58   :  { %90 = vst.msk [vmem:[#allocation2 + $0x70] sm:$0xff] %vm75_vm0, %v1982_v43  ;;  %91 = vst.msk [vmem:[#allocation2 + $0x78] sm:$0xff] %vm75_vm0, %v1982_v43  ;;  %v368_v20 = vld [vmem:[#allocation10 + $0x18] sm:$0xff]  ;;  %v370_v21 = vld [vmem:[#allocation10 + $0x28] sm:$0xff] }
  0x59   :  { %92 = vst.msk [vmem:[#allocation3] sm:$0xff] %vm75_vm0, %v1982_v43  ;;  %94 = vst.msk [vmem:[#allocation3 + $0x10] sm:$0xff] %vm75_vm0, %v1982_v43  ;;  %v372_v23 = vld [vmem:[#allocation10 + $0x38] sm:$0xff]  ;;  %v373_v24 = vld [vmem:[#allocation10 + $0x40] sm:$0xff] }
  0x5a   :  { %95 = vst.msk [vmem:[#allocation3 + $0x18] sm:$0xff] %vm75_vm0, %v1982_v43  ;;  %96 = vst.msk [vmem:[#allocation3 + $0x20] sm:$0xff] %vm75_vm0, %v1982_v43  ;;  %v376_v26 = vld [vmem:[#allocation10 + $0x58] sm:$0xff]  ;;  %v378_v27 = vld [vmem:[#allocation10 + $0x68] sm:$0xff] }
  0x5b   :  { %97 = vst.msk [vmem:[#allocation3 + $0x28] sm:$0xff] %vm75_vm0, %v1982_v43  ;;  %98 = vst.msk [vmem:[#allocation3 + $0x30] sm:$0xff] %vm75_vm0, %v1982_v43 }
  0x5c   :  { %99 = vst.msk [vmem:[#allocation3 + $0x38] sm:$0xff] %vm75_vm0, %v1982_v43  ;;  %100 = vst.msk [vmem:[#allocation3 + $0x40] sm:$0xff] %vm75_vm0, %v1982_v43 }
  0x5d   :  { %101 = vst.msk [vmem:[#allocation3 + $0x48] sm:$0xff] %vm75_vm0, %v1982_v43  ;;  %102 = vst.msk [vmem:[#allocation3 + $0x50] sm:$0xff] %vm75_vm0, %v1982_v43 }
  0x5e   :  { %1757 = vmatpush3.bf16.xpose.msra.mxu0 %v1754_v13  ;;  %1788 = vmatpush3.bf16.xpose.msra.mxu1 %v1754_v13  ;;  %103 = vst.msk [vmem:[#allocation3 + $0x58] sm:$0xff] %vm75_vm0, %v1982_v43  ;;  %104 = vst.msk [vmem:[#allocation3 + $0x60] sm:$0xff] %vm75_vm0, %v1982_v43 }
  0x5f   :  { %1759 = vmatprep.subr.bf16.mxu0 %v1758_v16  ;;  %1781 = vmatprep.subr.bf16.mxu1 %v1758_v16  ;;  %105 = vst.msk [vmem:[#allocation3 + $0x68] sm:$0xff] %vm75_vm0, %v1982_v43  ;;  %106 = vst.msk [vmem:[#allocation3 + $0x70] sm:$0xff] %vm75_vm0, %v1982_v43 }
  0x60   :  { %107 = vst.msk [vmem:[#allocation3 + $0x78] sm:$0xff] %vm75_vm0, %v1982_v43  ;;  %108 = vst.msk [vmem:[#allocation4] sm:$0xff] %vm75_vm0, %v1982_v43 }
  0x61   :  { %109 = vst.msk [vmem:[#allocation4 + $0x8] sm:$0xff] %vm75_vm0, %v1982_v43  ;;  %110 = vst.msk [vmem:[#allocation4 + $0x10] sm:$0xff] %vm75_vm0, %v1982_v43 }
  0x62   :  { %111 = vst.msk [vmem:[#allocation4 + $0x18] sm:$0xff] %vm75_vm0, %v1982_v43  ;;  %112 = vst.msk [vmem:[#allocation4 + $0x20] sm:$0xff] %vm75_vm0, %v1982_v43 }
  0x63   :  { %113 = vst.msk [vmem:[#allocation4 + $0x28] sm:$0xff] %vm75_vm0, %v1982_v43  ;;  %114 = vst.msk [vmem:[#allocation4 + $0x30] sm:$0xff] %vm75_vm0, %v1982_v43 }
  0x64   :  { %115 = vst.msk [vmem:[#allocation4 + $0x38] sm:$0xff] %vm75_vm0, %v1982_v43  ;;  %116 = vst.msk [vmem:[#allocation4 + $0x40] sm:$0xff] %vm75_vm0, %v1982_v43 }
  0x65   :  { %117 = vst.msk [vmem:[#allocation4 + $0x48] sm:$0xff] %vm75_vm0, %v1982_v43  ;;  %118 = vst.msk [vmem:[#allocation4 + $0x50] sm:$0xff] %vm75_vm0, %v1982_v43 }
  0x66   :  { %1761 = vmatpush3.bf16.xpose.msra.mxu0 %v1758_v16  ;;  %1789 = vmatpush3.bf16.xpose.msra.mxu1 %v1758_v16  ;;  %119 = vst.msk [vmem:[#allocation4 + $0x58] sm:$0xff] %vm75_vm0, %v1982_v43  ;;  %120 = vst.msk [vmem:[#allocation4 + $0x60] sm:$0xff] %vm75_vm0, %v1982_v43  ;;  %v367_v16 = vld [vmem:[#allocation10 + $0x10] sm:$0xff] }
  0x67   :  { %1763 = vmatprep.subr.bf16.mxu0 %v1762_v19  ;;  %1782 = vmatprep.subr.bf16.mxu1 %v1762_v19  ;;  %121 = vst.msk [vmem:[#allocation4 + $0x68] sm:$0xff] %vm75_vm0, %v1982_v43  ;;  %122 = vst.msk [vmem:[#allocation4 + $0x70] sm:$0xff] %vm75_vm0, %v1982_v43 }
  0x68   :  { %123 = vst.msk [vmem:[#allocation4 + $0x78] sm:$0xff] %vm75_vm0, %v1982_v43 }
  0x6e   :  { %1765 = vmatpush3.bf16.xpose.msra.mxu0 %v1762_v19  ;;  %1790 = vmatpush3.bf16.xpose.msra.mxu1 %v1762_v19  ;;  %v379_v19 = vld [vmem:[#allocation10 + $0x70] sm:$0xff] }
  0x6f   :  { %1767 = vmatprep.subr.bf16.mxu0 %v1766_v22  ;;  %1783 = vmatprep.subr.bf16.mxu1 %v1766_v22 }
  0x76   :  { %1769 = vmatpush3.bf16.xpose.msra.mxu0 %v1766_v22  ;;  %1791 = vmatpush3.bf16.xpose.msra.mxu1 %v1766_v22  ;;  %v371_v22 = vld [vmem:[#allocation10 + $0x30] sm:$0xff] }
  0x77   :  { %1771 = vmatprep.subr.bf16.mxu0 %v1770_v25  ;;  %1784 = vmatprep.subr.bf16.mxu1 %v1770_v25 }
  0x7e   :  { %1773 = vmatpush3.bf16.xpose.msra.mxu0 %v1770_v25  ;;  %1792 = vmatpush3.bf16.xpose.msra.mxu1 %v1770_v25  ;;  %v374_v25 = vld [vmem:[#allocation10 + $0x48] sm:$0xff] }
  0x7f   :  { %1775 = vmatprep.subr.bf16.mxu0 %v1774_v28  ;;  %1785 = vmatprep.subr.bf16.mxu1 %v1774_v28 }
  0x86   :  { %1777 = vmatpush3.bf16.xpose.msra.mxu0 %v1774_v28  ;;  %1793 = vmatpush3.bf16.xpose.msra.mxu1 %v1774_v28  ;;  %v380_v28 = vld [vmem:[#allocation10 + $0x78] sm:$0xff] }
  0x8d   :  { %1723 = vmatmul.mubr.f32.vlgmr.msra.gmra.mrb[0].mxu0 %v125_v29  ;;  %1735 = vmatmul.mubr.f32.vlgmr.msra.gmra.mrb[0].mxu1 %v133_v30  ;;  %v895_v29 = vld [vmem:[#allocation3 + $0x8] sm:$0xff] }
  0x8e   :  { %1725 = vmatprep.mubr.f32.mxu0 %v126_v31  ;;  %1737 = vmatprep.mubr.f32.mxu1 %v134_v32  ;;  %v799_v31 = vld [vmem:[#allocation2 + $0x8] sm:$0xff] }
  0x91   :  { %1726 = vmatmul.mubr.f32.gmra.mrb[2].mxu0 %v127_v33  ;;  %1738 = vmatmul.mubr.f32.gmra.mrb[2].mxu1 %v135_v34  ;;  %v894_v34 = vld [vmem:[#allocation3] sm:$0xff] }
  0x92   :  { %1728 = vmatprep.mubr.f32.mxu0 %v128_v35  ;;  %1740 = vmatprep.mubr.f32.mxu1 %v136_v36 }
  0x95   :  { %1729 = vmatmul.mubr.f32.gmra.mrb[4].mxu0 %v129_v37  ;;  %1741 = vmatmul.mubr.f32.gmra.mrb[4].mxu1 %v137_v38  ;;  %v798_v38 = vld [vmem:[#allocation2] sm:$0xff] }
  0x96   :  { %1743 = vmatprep.mubr.f32.mxu1 %v138_v39  ;;  %1731 = vmatprep.mubr.f32.mxu0 %v130_v40 }
  0x99   :  { %1744 = vmatmul.mubr.f32.gmra.mrb[6].mxu1 %v139_v41  ;;  %1732 = vmatmul.mubr.f32.gmra.mrb[6].mxu0 %v131_v42  ;;  %v483_v41 = vld [vmem:[#allocation4 + $0x8] sm:$0xff] }
  0xcf   :  { %v387_v59 = vpop.permute.xlu0 %386 }
  0xd0   :  { %vm435_vm1 = vcmp.eq.s32.totalorder %v387_v59, %v2183_v58 }
  0xd1   :  { %v1611_v0 = vsel %vm435_vm1, 1.0, %v1982_v43 }
  0xd3   :  { %v384_v1 = vpop.permute.xlu0 %383 }
  0xd4   :  { %vm434_vm3 = vcmp.eq.s32.totalorder %v384_v1, %v2183_v58 }
  0xd5   :  { %v1610_v6 = vsel %vm434_vm3, 1.0, %v1982_v43 }
 0x160   :  { %v1724_v44 = vpop.f32.mrb[0].mxu0  ;;  %v2169_v45 = vpop.f32.mrb[0].mxu1 }
 0x161   :  { %v1594_v46 = vclamps-f32 %v1724_v44, 10.0  ;;  %v222_v47 = vpop.f32.mrb[1].mxu0  ;;  %v2171_v49 = vpop.f32.mrb[1].mxu1 }
 0x162   :  { %v1593_v50 = vclamps-f32 %v222_v47, 10.0 }
 0x163   :  { %v335_v51 = vmul.f32 1.442695, %v1594_v46 }
 0x164   :  { %v333_v52 = vmul.f32 1.442695, %v1593_v50  ;;  %v2173_v53 = vpop.f32.mrb[2].mxu0  ;;  %v2175_v54 = vpop.f32.mrb[2].mxu1 }
 0x165   :  { %1813 = vpow2.f32 %v335_v51  ;;  %v2179_v56 = vpop.f32.mrb[3].mxu0  ;;  %v2181_v57 = vpop.f32.mrb[3].mxu1  ;;  %v482_v51 = vld [vmem:[#allocation4] sm:$0xff] }
 0x166   :  { %1815 = vpow2.f32 %v333_v52 }
 0x168   :  { %v2185_v60 = vpop.f32.mrb[4].mxu0  ;;  %v2202_v9 = vpop.f32.mrb[4].mxu1 }
 0x169   :  { %v2192_v63 = vpop.f32.mrb[5].mxu0  ;;  %v2204_v10 = vpop.f32.mrb[5].mxu1 }
 0x16c   :  { %v2206_v11 = vpop.f32.mrb[6].mxu1  ;;  %v2210_v17 = vpop.f32.mrb[6].mxu0 }
 0x16d   :  { %v2208_v13 = vpop.f32.mrb[7].mxu1  ;;  %v2212_v18 = vpop.f32.mrb[7].mxu0 }
 0x16f   :  { %v1814_v2 = vpop.eup %1813 }
 0x170   :  { %v783_v3 = vsel %vm767_vm2, 0.0, %v1814_v2  ;;  %v1816_v4 = vpop.eup %1815 }
 0x171   :  { %912 = vadd.xlane.f32.xlu1 %v783_v3  ;;  %v815_v5 = vmul.f32 %v1611_v0, %v783_v3  ;;  %v782_v7 = vsel %vm766_vm4, 0.0, %v1816_v4 }
 0x172   :  { %v814_v8 = vmul.f32 %v1610_v6, %v782_v7 }
 0x173   :  { %832 = vadd.xlane.f32.xlu0 %v815_v5 }
 0x175   :  { %910 = vadd.xlane.f32.xlu1 %v782_v7 }
 0x179   :  { %830 = vadd.xlane.f32.xlu1 %v814_v8 }
 0x17d   :  { %500 = vadd.xlane.f32.xlu1 %v1611_v0 }
 0x181   :  { %498 = vadd.xlane.f32.xlu1 %v1610_v6 }
 0x189   :  { %395 = vperm.xlu0 %1811, %v369_v12  }
 0x18d   :  { %413 = vperm.xlu0 %1811, %v375_v14  }
 0x191   :  { %419 = vperm.xlu0 %1811, %v377_v15  }
 0x192   :  { %389 = vperm.xlu1 %1812, %v367_v16  }
 0x195   :  { %425 = vperm.xlu0 %1811, %v379_v19  }
 0x196   :  { %392 = vperm.xlu1 %1812, %v368_v20  }
 0x19a   :  { %398 = vperm.xlu1 %1812, %v370_v21  }
 0x19e   :  { %401 = vperm.xlu1 %1812, %v371_v22  }
 0x1a2   :  { %404 = vperm.xlu1 %1812, %v372_v23  }
 0x1a6   :  { %407 = vperm.xlu1 %1812, %v373_v24  }
 0x1aa   :  { %410 = vperm.xlu1 %1812, %v374_v25  }
 0x1ae   :  { %416 = vperm.xlu1 %1812, %v376_v26  }
 0x1b2   :  { %422 = vperm.xlu1 %1812, %v378_v27  }
 0x1b6   :  { %428 = vperm.xlu1 %1812, %v380_v28  }
 0x1fe   :  { %v913_v30 = vpop.xlane.xlu1 %912 }
 0x1ff   :  { %v943_v32 = vadd.f32 %v913_v30, %v895_v29  ;;  %v1595_v29 = vclamps-f32 %v2179_v56, 10.0  ;;  %v1597_v56 = vclamps-f32 %v2192_v63, 10.0 }
 0x200   :  { %v833_v33 = vpop.xlane.xlu0 %832 }
 0x201   :  { %959 = vst.msk [vmem:[#allocation3 + $0x8] sm:$0xff] %vm75_vm0, %v943_v32  ;;  %v863_v35 = vadd.f32 %v833_v33, %v799_v31  ;;  %v341_v63 = vmul.f32 1.442695, %v1597_v56 }
 0x202   :  { %v911_v36 = vpop.xlane.xlu1 %910 }
 0x203   :  { %879 = vst.msk [vmem:[#allocation2 + $0x8] sm:$0xff] %vm75_vm0, %v863_v35  ;;  %v942_v37 = vadd.f32 %v911_v36, %v894_v34  ;;  %v337_v35 = vmul.f32 1.442695, %v1595_v29 }
 0x205   :  { %958 = vst.msk [vmem:[#allocation3] sm:$0xff] %vm75_vm0, %v942_v37 }
 0x206   :  { %v831_v39 = vpop.xlane.xlu1 %830 }
 0x207   :  { %v862_v40 = vadd.f32 %v831_v39, %v798_v38 }
 0x208   :  { %v994_v42 = vld [vmem:[#allocation3 + $0x8] sm:$0xff]  ;;  %v396_v6 = vpop.permute.xlu0 %395 }
 0x209   :  { %878 = vst.msk [vmem:[#allocation2] sm:$0xff] %vm75_vm0, %v862_v40  ;;  %v1627_v44 = vadd.f32 -118.0, %v994_v42  ;;  %vm438_vm6 = vcmp.eq.s32.totalorder %v396_v6, %v2183_v58 }
 0x20a   :  { %v501_v46 = vpop.xlane.xlu1 %500  ;;  %v978_v47 = vld [vmem:[#allocation2 + $0x8] sm:$0xff]  ;;  %v2228_v16 = vsel %vm438_vm6, 1.0, %v1982_v43 }
 0x20b   :  { %v531_v48 = vadd.f32 %v501_v46, %v483_v41  ;;  %v1026_v50 = vsub.f32 %v1627_v44, %v978_v47  ;;  %vm1218_vm10 = vcmp.gt.f32.partialorder %v978_v47, 0.0 }
 0x20c   :  { %v993_v52 = vld [vmem:[#allocation3] sm:$0xff]  ;;  %v1643_v33 = vsel %vm1218_vm10, 1.0, %v1982_v43  ;;  %v414_v36 = vpop.permute.xlu0 %413 }
 0x20d   :  { %548 = vst.msk [vmem:[#allocation4 + $0x8] sm:$0xff] %vm75_vm0, %v531_v48  ;;  %v1058_v59 = vadd.f32 %v1026_v50, %v978_v47  ;;  %v1626_v2 = vadd.f32 -118.0, %v993_v52  ;;  %v1389_v39 = vsel %vm1301_vm13, %v1643_v33, 0.0  ;;  %vm444_vm1 = vcmp.eq.s32.totalorder %v414_v36, %v2183_v58 }
 0x20e   :  { %v499_v0 = vpop.xlane.xlu1 %498  ;;  %v1405_v50 = vsel %vm75_vm0, %v1389_v39, 0.0  ;;  %v1598_v36 = vclamps-f32 %v2185_v60, 10.0 }
 0x20f   :  { %v530_v1 = vadd.f32 %v499_v0, %v482_v51  ;;  %v1074_v3 = vadd.f32 1e-08, %v1058_v59 }
 0x210   :  { %v977_v4 = vld [vmem:[#allocation2] sm:$0xff]  ;;  %v420_v0 = vpop.permute.xlu0 %419 }
 0x211   :  { %547 = vst.msk [vmem:[#allocation4] sm:$0xff] %vm75_vm0, %v530_v1  ;;  %1817 = vrcp.f32 %v1074_v3  ;;  %v1025_v5 = vsub.f32 %v1626_v2, %v977_v4  ;;  %vm1217_vm11 = vcmp.gt.f32.partialorder %v977_v4, 0.0  ;;  %v1601_v3 = vclamps-f32 %v2171_v49, 10.0 }
 0x212   :  { %v390_v7 = vpop.permute.xlu1 %389  ;;  %v1642_v34 = vsel %vm1217_vm11, 1.0, %v1982_v43  ;;  %vm446_vm2 = vcmp.eq.s32.totalorder %v420_v0, %v2183_v58  ;;  %v1596_v49 = vclamps-f32 %v2173_v53, 10.0 }
 0x213   :  { %vm436_vm5 = vcmp.eq.s32.totalorder %v390_v7, %v2183_v58  ;;  %v1057_v8 = vadd.f32 %v1025_v5, %v977_v4  ;;  %v1404_v42 = vsel %vm75_vm0, %v1642_v34, 0.0 }
 0x214   :  { %v2222_v12 = vsel %vm436_vm5, 1.0, %v1982_v43  ;;  %v1042_v21 = vld [vmem:[#allocation4 + $0x8] sm:$0xff]  ;;  %v1406_v51 = vadd.f32 %v1405_v50, %v1404_v42  ;;  %v339_v56 = vmul.f32 1.442695, %v1596_v49  ;;  %v1607_v50 = vclamps-f32 %v2208_v13, 10.0 }
 0x215   :  { %502 = vadd.xlane.f32.xlu1 %v2222_v12  ;;  %v1073_v14 = vadd.f32 1e-08, %v1057_v8 }
 0x216   :  { %v393_v15 = vpop.permute.xlu1 %392  ;;  %v361_v13 = vmul.f32 1.442695, %v1607_v50 }
 0x217   :  { %vm437_vm7 = vcmp.eq.s32.totalorder %v393_v15, %v2183_v58  ;;  %1819 = vrcp.f32 %v1073_v14  ;;  %v2277_v14 = vsel %vm444_vm1, 1.0, %v1982_v43  ;;  %v750_v15 = vadd.s32 16, %v2177_v55 }
 0x218   :  { %v2231_v19 = vsel %vm437_vm7, 1.0, %v1982_v43  ;;  %v1041_v24 = vld [vmem:[#allocation4] sm:$0xff]  ;;  %1821 = vrcp.f32 %v1042_v21  ;;  %v426_v21 = vpop.permute.xlu0 %425  ;;  %vm772_vm7 = vcmp.eq.s32.totalorder %v754_v61, %v2190_v62 }
 0x219   :  { %506 = vadd.xlane.f32.xlu1 %v2228_v16  ;;  %504 = vadd.xlane.f32.xlu0 %v2231_v19  ;;  %vm768_vm3 = vcmp.eq.s32.totalorder %v750_v15, %v2190_v62  ;;  %vm448_vm4 = vcmp.eq.s32.totalorder %v426_v21, %v2183_v58  ;;  %v1604_v15 = vclamps-f32 %v2175_v54, 10.0 }
 0x21a   :  { %v399_v20 = vpop.permute.xlu1 %398 }
 0x21b   :  { %v1818_v22 = vpop.eup %1817  ;;  %vm439_vm8 = vcmp.eq.s32.totalorder %v399_v20, %v2183_v58 }
 0x21c   :  { %v2237_v23 = vsel %vm439_vm8, 1.0, %v1982_v43  ;;  %v1092_v25 = vmul.f32 %v1818_v22, %v978_v47  ;;  %v1599_v47 = vclamps-f32 %v2212_v18, 10.0 }
 0x21d   :  { %508 = vadd.xlane.f32.xlu0 %v2237_v23 }
 0x21e   :  { %v402_v26 = vpop.permute.xlu1 %401  ;;  %1823 = vlog2.f32 %v1092_v25  ;;  %v345_v6 = vmul.f32 1.442695, %v1599_v47  ;;  %v349_v25 = vmul.f32 1.442695, %v1601_v3 }
 0x21f   :  { %vm440_vm9 = vcmp.eq.s32.totalorder %v402_v26, %v2183_v58  ;;  %1825 = vrcp.f32 %v1041_v24  ;;  %v1603_v26 = vclamps-f32 %v2181_v57, 10.0 }
 0x220   :  { %v2242_v27 = vsel %vm440_vm9, 1.0, %v1982_v43 }
 0x221   :  { %v1820_v28 = vpop.eup %1819  ;;  %510 = vadd.xlane.f32.xlu1 %v2242_v27  ;;  %v353_v39 = vmul.f32 1.442695, %v1603_v26 }
 0x222   :  { %v405_v30 = vpop.permute.xlu1 %404  ;;  %v1090_v31 = vmul.f32 %v1820_v28, %v977_v4  ;;  %v1822_v38 = vpop.eup %1821 }
 0x223   :  { %vm441_vm12 = vcmp.eq.s32.totalorder %v405_v30, %v2183_v58  ;;  %v1445_v52 = vsel %vm1301_vm13, %v1822_v38, 0.0  ;;  %v2287_v30 = vsel %vm446_vm2, 1.0, %v1982_v43 }
 0x224   :  { %v2249_v32 = vsel %vm441_vm12, 1.0, %v1982_v43  ;;  %1827 = vlog2.f32 %v1090_v31  ;;  %v1461_v4 = vsel %vm75_vm0, %v1445_v52, 0.0  ;;  %v752_v31 = vadd.s32 32, %v2177_v55 }
 0x225   :  { %512 = vadd.xlane.f32.xlu0 %v2249_v32  ;;  %1829 = vpow2.f32 %v337_v35 }
 0x226   :  { %v408_v37 = vpop.permute.xlu1 %407  ;;  %1831 = vpow2.f32 %v341_v63  ;;  %vm770_vm5 = vcmp.eq.s32.totalorder %v752_v31, %v2190_v62  ;;  %v1600_v63 = vclamps-f32 %v2210_v17, 10.0  ;;  %v756_v17 = vadd.s32 64, %v2177_v55 }
 0x227   :  { %vm442_vm14 = vcmp.eq.s32.totalorder %v408_v37, %v2183_v58  ;;  %1833 = vpow2.f32 %v345_v6 }
 0x228   :  { %v1824_v40 = vpop.eup %1823  ;;  %v2259_v41 = vsel %vm442_vm14, 1.0, %v1982_v43  ;;  %1835 = vpow2.f32 %v349_v25  ;;  %vm774_vm9 = vcmp.eq.s32.totalorder %v756_v17, %v2190_v62  ;;  %v355_v25 = vmul.f32 1.442695, %v1604_v15 }
 0x229   :  { %v1826_v44 = vpop.eup %1825  ;;  %514 = vadd.xlane.f32.xlu1 %v2259_v41  ;;  %v1124_v46 = vmul.f32 0.6931472, %v1824_v40  ;;  %v1605_v40 = vclamps-f32 %v2204_v10, 10.0  ;;  %1837 = vpow2.f32 %v339_v56  ;;  %v343_v10 = vmul.f32 1.442695, %v1598_v36 }
 0x22a   :  { %v411_v48 = vpop.permute.xlu1 %410  ;;  %v1460_v2 = vsel %vm75_vm0, %v1826_v44, 0.0  ;;  %1839 = vpow2.f32 %v353_v39 }
 0x22b   :  { %vm443_vm15 = vcmp.eq.s32.totalorder %v411_v48, %v2183_v58  ;;  %v1154_v59 = vsub.f32 0.0, %v1124_v46  ;;  %v1462_v7 = vadd.f32 %v1461_v4, %v1460_v2  ;;  %v357_v48 = vmul.f32 1.442695, %v1605_v40 }
 0x22c   :  { %v2269_v1 = vsel %vm443_vm15, 1.0, %v1982_v43  ;;  %1841 = vpow2.f32 %v343_v10  ;;  %v1602_v2 = vclamps-f32 %v2169_v45, 10.0  ;;  %v758_v45 = vadd.s32 80, %v2177_v55 }
 0x22d   :  { %516 = vadd.xlane.f32.xlu0 %v2269_v1  ;;  %1435 = vadd.xlane.f32.xlu1 %v1406_v51  ;;  %v1202_v5 = vmul.f32 %v1822_v38, %v1154_v59  ;;  %1843 = vpow2.f32 %v357_v48 }
 0x22e   :  { %v1828_v18 = vpop.eup %1827  ;;  %v417_v53 = vpop.permute.xlu1 %416  ;;  %vm776_vm12 = vcmp.eq.s32.totalorder %v758_v45, %v2190_v62 }
 0x22f   :  { %v1122_v8 = vmul.f32 0.6931472, %v1828_v18  ;;  %v1501_v22 = vsel %vm1301_vm13, %v1202_v5, 0.0  ;;  %v1317_v24 = vmul.f32 %v1643_v33, %v1202_v5  ;;  %v1830_v29 = vpop.eup %1829  ;;  %vm445_vm6 = vcmp.eq.s32.totalorder %v417_v53, %v2183_v58 }
 0x230   :  { %v1517_v35 = vsel %vm75_vm0, %v1501_v22, 0.0  ;;  %v1832_v46 = vpop.eup %1831  ;;  %v347_v18 = vmul.f32 1.442695, %v1600_v63  ;;  %v2322_v3 = vsel %vm445_vm6, 1.0, %v1982_v43  ;;  %v751_v5 = vadd.s32 24, %v2177_v55 }
 0x231   :  { %1491 = vadd.xlane.f32.xlu0 %v1462_v7  ;;  %518 = vadd.xlane.f32.xlu1 %v2277_v14  ;;  %v1153_v20 = vsub.f32 0.0, %v1122_v8  ;;  %v1333_v38 = vsel %vm1301_vm13, %v1317_v24, 0.0  ;;  %v2316_v59 = vsel %vm770_vm5, 0.0, %v1832_v46  ;;  %v1834_v0 = vpop.eup %1833  ;;  %v351_v8 = vmul.f32 1.442695, %v1602_v2 }
 0x232   :  { %v1349_v60 = vsel %vm75_vm0, %v1333_v38, 0.0  ;;  %v423_v51 = vpop.permute.xlu1 %422  ;;  %v2328_v4 = vsel %vm772_vm7, 0.0, %v1834_v0  ;;  %v1836_v6 = vpop.eup %1835  ;;  %1845 = vpow2.f32 %v347_v18  ;;  %vm769_vm11 = vcmp.eq.s32.totalorder %v751_v5, %v2190_v62  ;;  %v485_v18 = vld [vmem:[#allocation4 + $0x18] sm:$0xff] }
 0x233   :  { %v1201_v28 = vmul.f32 %v1826_v44, %v1153_v20  ;;  %v2301_v44 = vsel %vm448_vm4, 1.0, %v1982_v43  ;;  %vm447_vm8 = vcmp.eq.s32.totalorder %v423_v51, %v2183_v58  ;;  %1847 = vpow2.f32 %v361_v13  ;;  %v1838_v49 = vpop.eup %1837  ;;  %v486_v13 = vld [vmem:[#allocation4 + $0x20] sm:$0xff] }
 0x234   :  { %v820_v20 = vmul.f32 %v2242_v27, %v2328_v4  ;;  %v2341_v21 = vsel %vm774_vm9, 0.0, %v1836_v6  ;;  %v753_v22 = vadd.s32 40, %v2177_v55  ;;  %v1840_v54 = vpop.eup %1839  ;;  %v760_v24 = vadd.s32 96, %v2177_v55  ;;  %v487_v6 = vld [vmem:[#allocation4 + $0x28] sm:$0xff] }
 0x235   :  { %522 = vadd.xlane.f32.xlu1 %v2287_v30  ;;  %v1516_v33 = vsel %vm75_vm0, %v1201_v28, 0.0  ;;  %v1316_v57 = vmul.f32 %v1642_v34, %v1201_v28  ;;  %v2305_v34 = vsel %vm768_vm3, 0.0, %v1830_v29  ;;  %1849 = vpow2.f32 %v351_v8  ;;  %v488_v8 = vld [vmem:[#allocation4 + $0x30] sm:$0xff] }
 0x236   :  { %v1518_v37 = vadd.f32 %v1517_v35, %v1516_v33  ;;  %v816_v52 = vmul.f32 %v2222_v12, %v2305_v34  ;;  %v818_v12 = vmul.f32 %v2228_v16, %v2316_v59  ;;  %v429_v7 = vpop.permute.xlu1 %428  ;;  %v2335_v16 = vsel %vm447_vm8, 1.0, %v1982_v43  ;;  %v1842_v29 = vpop.eup %1841 }
 0x237   :  { %v1348_v42 = vsel %vm75_vm0, %v1316_v57, 0.0  ;;  %vm449_vm10 = vcmp.eq.s32.totalorder %v429_v7, %v2183_v58  ;;  %v1606_v27 = vclamps-f32 %v2202_v9, 10.0  ;;  %v822_v26 = vmul.f32 %v2259_v41, %v2341_v21  ;;  %v1844_v33 = vpop.eup %1843 }
 0x238   :  { %1547 = vadd.xlane.f32.xlu0 %v1518_v37  ;;  %v1350_v47 = vadd.f32 %v1349_v60, %v1348_v42  ;;  %v2349_v58 = vsel %vm449_vm10, 1.0, %v1982_v43  ;;  %v2353_v28 = vsel %vm769_vm11, 0.0, %v1838_v49  ;;  %v792_v31 = vsel %vm776_vm12, 0.0, %v1840_v54 }
 0x239   :  { %526 = vadd.xlane.f32.xlu1 %v2301_v44  ;;  %vm771_vm13 = vcmp.eq.s32.totalorder %v753_v22, %v2190_v62  ;;  %v755_v53 = vadd.s32 56, %v2177_v55  ;;  %vm778_vm14 = vcmp.eq.s32.totalorder %v760_v24, %v2190_v62  ;;  %v762_v43 = vadd.s32 112, %v2177_v55  ;;  %v490_v22 = vld [vmem:[#allocation4 + $0x40] sm:$0xff] }
 0x23a   :  { %1851 = vpow2.f32 %v355_v25  ;;  %v359_v9 = vmul.f32 1.442695, %v1606_v27  ;;  %v1608_v41 = vclamps-f32 %v2206_v11, 10.0  ;;  %v817_v35 = vmul.f32 %v2231_v19, %v2353_v28  ;;  %v491_v25 = vld [vmem:[#allocation4 + $0x48] sm:$0xff] }
 0x23b   :  { %v824_v57 = vmul.f32 %v2277_v14, %v792_v31  ;;  %v787_v56 = vsel %vm771_vm13, 0.0, %v1842_v29  ;;  %v794_v37 = vsel %vm778_vm14, 0.0, %v1844_v33  ;;  %vm773_vm15 = vcmp.eq.s32.totalorder %v755_v53, %v2190_v62  ;;  %v494_v33 = vld [vmem:[#allocation4 + $0x60] sm:$0xff] }
 0x23c   :  { %1379 = vadd.xlane.f32.xlu0 %v1350_v47  ;;  %v1846_v36 = vpop.eup %1845  ;;  %v757_v38 = vadd.s32 72, %v2177_v55  ;;  %vm780_vm1 = vcmp.eq.s32.totalorder %v762_v43, %v2190_v62  ;;  %1853 = vpow2.f32 %v359_v9  ;;  %v363_v40 = vmul.f32 1.442695, %v1608_v41 }
 0x23d   :  { %834 = vadd.xlane.f32.xlu1 %v816_v52  ;;  %v1848_v39 = vpop.eup %1847  ;;  %v819_v11 = vmul.f32 %v2237_v23, %v787_v56  ;;  %v826_v19 = vmul.f32 %v2287_v30, %v794_v37  ;;  %v789_v42 = vsel %vm773_vm15, 0.0, %v1846_v36  ;;  %v759_v60 = vadd.s32 88, %v2177_v55 }
 0x23e   :  { %v796_v46 = vsel %vm780_vm1, 0.0, %v1848_v39  ;;  %vm775_vm2 = vcmp.eq.s32.totalorder %v757_v38, %v2190_v62  ;;  %1855 = vpow2.f32 %v363_v40  ;;  %v821_v61 = vmul.f32 %v2249_v32, %v789_v42 }
 0x23f   :  { %v1850_v14 = vpop.eup %1849  ;;  %v828_v10 = vmul.f32 %v2301_v44, %v796_v46  ;;  %vm777_vm3 = vcmp.eq.s32.totalorder %v759_v60, %v2190_v62  ;;  %v761_v23 = vadd.s32 104, %v2177_v55  ;;  %v763_v51 = vadd.s32 120, %v2177_v55 }
 0x240   :  { %520 = vadd.xlane.f32.xlu0 %v2322_v3  ;;  %v791_v63 = vsel %vm775_vm2, 0.0, %v1850_v14  ;;  %vm1558_vm6 = vcmp.eq.s32.totalorder %v2177_v55, 0  ;;  %vm1559_vm7 = vcmp.eq.s32.totalorder %v2190_v62, 0  ;;  %vm1563_vm8 = vcmp.eq.s32.totalorder %v2190_v62, 1 }
 0x241   :  { %838 = vadd.xlane.f32.xlu1 %v818_v12  ;;  %v823_v30 = vmul.f32 %v2269_v1, %v791_v63  ;;  %vm779_vm4 = vcmp.eq.s32.totalorder %v761_v23, %v2190_v62  ;;  %vm781_vm5 = vcmp.eq.s32.totalorder %v763_v51, %v2190_v62  ;;  %vm1567_vm9 = vcmp.eq.s32.totalorder %v2190_v62, 2  ;;  %vm1560_vm10 = vmand %vm1558_vm6, %vm1559_vm7 }
 0x242   :  { %vm1571_vm11 = vcmp.eq.s32.totalorder %v2190_v62, 3  ;;  %vm1564_vm12 = vmand %vm1558_vm6, %vm1563_vm8 }
 0x243   :  { %vm1568_vm13 = vmand %vm1558_vm6, %vm1567_vm9 }
 0x244   :  { %524 = vadd.xlane.f32.xlu0 %v2335_v16  ;;  %v1852_v47 = vpop.eup %1851  ;;  %vm1572_vm14 = vmand %vm1558_vm6, %vm1571_vm11 }
 0x245   :  { %842 = vadd.xlane.f32.xlu1 %v820_v20  ;;  %v793_v48 = vsel %vm777_vm3, 0.0, %v1852_v47  ;;  %v489_v20 = vld [vmem:[#allocation4 + $0x38] sm:$0xff] }
 0x246   :  { %v1854_v50 = vpop.eup %1853  ;;  %v825_v32 = vmul.f32 %v2322_v3, %v793_v48  ;;  %v493_v47 = vld [vmem:[#allocation4 + $0x58] sm:$0xff] }
 0x247   :  { %v795_v44 = vsel %vm779_vm4, 0.0, %v1854_v50 }
 0x248   :  { %528 = vadd.xlane.f32.xlu0 %v2349_v58  ;;  %v1856_v52 = vpop.eup %1855  ;;  %v827_v1 = vmul.f32 %v2335_v16, %v795_v44 }
 0x249   :  { %846 = vadd.xlane.f32.xlu1 %v822_v26  ;;  %v797_v0 = vsel %vm781_vm5, 0.0, %v1856_v52 }
 0x24a   :  { %v829_v17 = vmul.f32 %v2349_v58, %v797_v0 }
 0x24c   :  { %836 = vadd.xlane.f32.xlu0 %v817_v35 }
 0x24d   :  { %850 = vadd.xlane.f32.xlu1 %v824_v57  ;;  %v496_v57 = vld [vmem:[#allocation4 + $0x70] sm:$0xff] }
 0x250   :  { %840 = vadd.xlane.f32.xlu0 %v819_v11 }
 0x251   :  { %854 = vadd.xlane.f32.xlu1 %v826_v19  ;;  %v800_v19 = vld [vmem:[#allocation2 + $0x10] sm:$0xff] }
 0x254   :  { %844 = vadd.xlane.f32.xlu0 %v821_v61 }
 0x255   :  { %858 = vadd.xlane.f32.xlu1 %v828_v10 }
 0x258   :  { %848 = vadd.xlane.f32.xlu0 %v823_v30  ;;  %v802_v30 = vld [vmem:[#allocation2 + $0x20] sm:$0xff] }
 0x259   :  { %914 = vadd.xlane.f32.xlu1 %v2305_v34  ;;  %v484_v34 = vld [vmem:[#allocation4 + $0x10] sm:$0xff] }
 0x25c   :  { %852 = vadd.xlane.f32.xlu0 %v825_v32 }
 0x25d   :  { %918 = vadd.xlane.f32.xlu1 %v2316_v59 }
 0x260   :  { %856 = vadd.xlane.f32.xlu0 %v827_v1 }
 0x261   :  { %922 = vadd.xlane.f32.xlu1 %v2328_v4 }
 0x264   :  { %860 = vadd.xlane.f32.xlu0 %v829_v17 }
 0x265   :  { %926 = vadd.xlane.f32.xlu1 %v2341_v21 }
 0x268   :  { %916 = vadd.xlane.f32.xlu0 %v2353_v28  ;;  %v492_v28 = vld [vmem:[#allocation4 + $0x50] sm:$0xff] }
 0x269   :  { %930 = vadd.xlane.f32.xlu1 %v792_v31 }
 0x26c   :  { %920 = vadd.xlane.f32.xlu0 %v787_v56 }
 0x26d   :  { %934 = vadd.xlane.f32.xlu1 %v794_v37 }
 0x270   :  { %924 = vadd.xlane.f32.xlu0 %v789_v42 }
 0x271   :  { %938 = vadd.xlane.f32.xlu1 %v796_v46 }
 0x274   :  { %928 = vadd.xlane.f32.xlu0 %v791_v63 }
 0x278   :  { %932 = vadd.xlane.f32.xlu0 %v793_v48 }
 0x27c   :  { %936 = vadd.xlane.f32.xlu0 %v795_v44 }
 0x280   :  { %940 = vadd.xlane.f32.xlu0 %v797_v0  ;;  %v495_v0 = vld [vmem:[#allocation4 + $0x68] sm:$0xff] }
 0x2a2   :  { %v503_v59 = vpop.xlane.xlu1 %502 }
 0x2a3   :  { %v532_v2 = vadd.f32 %v503_v59, %v484_v34  ;;  %v804_v34 = vld [vmem:[#allocation2 + $0x30] sm:$0xff] }
 0x2a5   :  { %549 = vst.msk [vmem:[#allocation4 + $0x10] sm:$0xff] %vm75_vm0, %v532_v2 }
 0x2a6   :  { %v505_v3 = vpop.xlane.xlu0 %504  ;;  %v507_v12 = vpop.xlane.xlu1 %506 }
 0x2a7   :  { %v533_v4 = vadd.f32 %v505_v3, %v485_v18  ;;  %v534_v5 = vadd.f32 %v507_v12, %v486_v13 }
 0x2a9   :  { %550 = vst.msk [vmem:[#allocation4 + $0x18] sm:$0xff] %vm75_vm0, %v533_v4  ;;  %551 = vst.msk [vmem:[#allocation4 + $0x20] sm:$0xff] %vm75_vm0, %v534_v5 }
 0x2aa   :  { %v509_v7 = vpop.xlane.xlu0 %508 }
 0x2ab   :  { %v535_v45 = vadd.f32 %v509_v7, %v487_v6  ;;  %v497_v6 = vld [vmem:[#allocation4 + $0x78] sm:$0xff] }
 0x2ad   :  { %552 = vst.msk [vmem:[#allocation4 + $0x28] sm:$0xff] %vm75_vm0, %v535_v45  ;;  %v806_v45 = vld [vmem:[#allocation2 + $0x40] sm:$0xff] }
 0x2ae   :  { %v511_v15 = vpop.xlane.xlu1 %510 }
 0x2af   :  { %v536_v16 = vadd.f32 %v511_v15, %v488_v8 }
 0x2b1   :  { %553 = vst.msk [vmem:[#allocation4 + $0x30] sm:$0xff] %vm75_vm0, %v536_v16 }
 0x2b2   :  { %v513_v49 = vpop.xlane.xlu0 %512 }
 0x2b3   :  { %v537_v21 = vadd.f32 %v513_v49, %v489_v20 }
 0x2b5   :  { %554 = vst.msk [vmem:[#allocation4 + $0x38] sm:$0xff] %vm75_vm0, %v537_v21 }
 0x2b6   :  { %v515_v54 = vpop.xlane.xlu1 %514 }
 0x2b7   :  { %v538_v24 = vadd.f32 %v515_v54, %v490_v22 }
 0x2b9   :  { %555 = vst.msk [vmem:[#allocation4 + $0x40] sm:$0xff] %vm75_vm0, %v538_v24  ;;  %v801_v24 = vld [vmem:[#allocation2 + $0x18] sm:$0xff] }
 0x2ba   :  { %v517_v27 = vpop.xlane.xlu0 %516  ;;  %v1436_v58 = vpop.xlane.xlu1 %1435 }
 0x2bb   :  { %v539_v26 = vadd.f32 %v517_v27, %v491_v25  ;;  %v1437_v43 = vrot.slane %v1436_v58, 4  ;;  %v808_v25 = vld [vmem:[#allocation2 + $0x50] sm:$0xff] }
 0x2bd   :  { %556 = vst.msk [vmem:[#allocation4 + $0x48] sm:$0xff] %vm75_vm0, %v539_v26  ;;  %v1438_v56 = vadd.f32 %v1437_v43, %v1436_v58 }
 0x2be   :  { %v519_v29 = vpop.xlane.xlu1 %518  ;;  %v1492_v31 = vpop.xlane.xlu0 %1491 }
 0x2bf   :  { %v540_v53 = vadd.f32 %v519_v29, %v492_v28  ;;  %v1493_v9 = vrot.slane %v1492_v31, 4  ;;  %v1439_v42 = vrot.slane %v1438_v56, 2  ;;  %v803_v29 = vld [vmem:[#allocation2 + $0x28] sm:$0xff] }
 0x2c1   :  { %557 = vst.msk [vmem:[#allocation4 + $0x50] sm:$0xff] %vm75_vm0, %v540_v53  ;;  %v1494_v37 = vadd.f32 %v1493_v9, %v1492_v31  ;;  %v1440_v50 = vadd.f32 %v1439_v42, %v1438_v56  ;;  %v810_v31 = vld [vmem:[#allocation2 + $0x60] sm:$0xff] }
 0x2c2   :  { %v523_v41 = vpop.xlane.xlu1 %522 }
 0x2c3   :  { %v542_v35 = vadd.f32 %v523_v41, %v494_v33  ;;  %v1495_v46 = vrot.slane %v1494_v37, 2  ;;  %v1441_v18 = vrot.slane %v1440_v50, 1  ;;  %v805_v41 = vld [vmem:[#allocation2 + $0x38] sm:$0xff] }
 0x2c5   :  { %559 = vst.msk [vmem:[#allocation4 + $0x60] sm:$0xff] %vm75_vm0, %v542_v35  ;;  %v1548_v36 = vpop.xlane.xlu0 %1547  ;;  %v1496_v52 = vadd.f32 %v1495_v46, %v1494_v37  ;;  %v1442_v16 = vadd.f32 %v1441_v18, %v1440_v50  ;;  %v812_v35 = vld [vmem:[#allocation2 + $0x70] sm:$0xff]  ;;  %v898_v46 = vld [vmem:[#allocation3 + $0x20] sm:$0xff] }
 0x2c6   :  { %v1549_v38 = vrot.slane %v1548_v36, 4  ;;  %v527_v39 = vpop.xlane.xlu1 %526 }
 0x2c7   :  { %v544_v40 = vadd.f32 %v527_v39, %v496_v57  ;;  %v1497_v4 = vrot.slane %v1496_v52, 1  ;;  %v896_v39 = vld [vmem:[#allocation3 + $0x10] sm:$0xff] }
 0x2c8   :  { %v1550_v11 = vadd.f32 %v1549_v38, %v1548_v36  ;;  %v807_v38 = vld [vmem:[#allocation2 + $0x48] sm:$0xff] }
 0x2c9   :  { %561 = vst.msk [vmem:[#allocation4 + $0x70] sm:$0xff] %vm75_vm0, %v544_v40  ;;  %v1380_v14 = vpop.xlane.xlu0 %1379  ;;  %v1498_v21 = vadd.f32 %v1497_v4, %v1496_v52  ;;  %v906_v4 = vld [vmem:[#allocation3 + $0x60] sm:$0xff] }
 0x2ca   :  { %v1381_v60 = vrot.slane %v1380_v14, 4  ;;  %v835_v61 = vpop.xlane.xlu1 %834  ;;  %v1551_v10 = vrot.slane %v1550_v11, 2 }
 0x2cb   :  { %v864_v63 = vadd.f32 %v835_v61, %v800_v19 }
 0x2cc   :  { %v1382_v23 = vadd.f32 %v1381_v60, %v1380_v14  ;;  %v1552_v17 = vadd.f32 %v1551_v10, %v1550_v11  ;;  %v809_v14 = vld [vmem:[#allocation2 + $0x58] sm:$0xff] }
 0x2cd   :  { %880 = vst.msk [vmem:[#allocation2 + $0x10] sm:$0xff] %vm75_vm0, %v864_v63  ;;  %v521_v48 = vpop.xlane.xlu0 %520 }
 0x2ce   :  { %v1383_v51 = vrot.slane %v1382_v23, 2  ;;  %v541_v32 = vadd.f32 %v521_v48, %v493_v47  ;;  %v839_v44 = vpop.xlane.xlu1 %838  ;;  %v1553_v7 = vrot.slane %v1552_v17, 1  ;;  %v811_v47 = vld [vmem:[#allocation2 + $0x68] sm:$0xff] }
 0x2cf   :  { %v866_v1 = vadd.f32 %v839_v44, %v802_v30  ;;  %v902_v44 = vld [vmem:[#allocation3 + $0x40] sm:$0xff] }
 0x2d0   :  { %558 = vst.msk [vmem:[#allocation4 + $0x58] sm:$0xff] %vm75_vm0, %v541_v32  ;;  %v1384_v59 = vadd.f32 %v1383_v51, %v1382_v23  ;;  %v1554_v54 = vadd.f32 %v1553_v7, %v1552_v17  ;;  %v900_v23 = vld [vmem:[#allocation3 + $0x30] sm:$0xff]  ;;  %v813_v32 = vld [vmem:[#allocation2 + $0x78] sm:$0xff] }
 0x2d1   :  { %882 = vst.msk [vmem:[#allocation2 + $0x20] sm:$0xff] %vm75_vm0, %v866_v1  ;;  %v525_v2 = vpop.xlane.xlu0 %524 }
 0x2d2   :  { %v543_v13 = vadd.f32 %v525_v2, %v495_v0  ;;  %v843_v3 = vpop.xlane.xlu1 %842  ;;  %v1385_v12 = vrot.slane %v1384_v59, 1 }
 0x2d3   :  { %v868_v5 = vadd.f32 %v843_v3, %v804_v34  ;;  %v897_v34 = vld [vmem:[#allocation3 + $0x18] sm:$0xff] }
 0x2d4   :  { %560 = vst.msk [vmem:[#allocation4 + $0x68] sm:$0xff] %vm75_vm0, %v543_v13  ;;  %v1386_v8 = vadd.f32 %v1385_v12, %v1384_v59  ;;  %v904_v59 = vld [vmem:[#allocation3 + $0x50] sm:$0xff]  ;;  %v899_v12 = vld [vmem:[#allocation3 + $0x28] sm:$0xff] }
 0x2d5   :  { %884 = vst.msk [vmem:[#allocation2 + $0x30] sm:$0xff] %vm75_vm0, %v868_v5  ;;  %v529_v15 = vpop.xlane.xlu0 %528 }
 0x2d6   :  { %v545_v20 = vadd.f32 %v529_v15, %v497_v6  ;;  %v847_v49 = vpop.xlane.xlu1 %846  ;;  %1794 = vpush %v1386_v8  ;;  %v901_v8 = vld [vmem:[#allocation3 + $0x38] sm:$0xff]  ;;  %v908_v15 = vld [vmem:[#allocation3 + $0x70] sm:$0xff] }
 0x2d7   :  { %v870_v22 = vadd.f32 %v847_v49, %v806_v45  ;;  %1796 = vpush %v1442_v16 }
 0x2d8   :  { %562 = vst.msk [vmem:[#allocation4 + $0x78] sm:$0xff] %vm75_vm0, %v545_v20 }
 0x2d9   :  { %1798 = vpush %v1498_v21  ;;  %v837_v27 = vpop.xlane.xlu0 %836 }
 0x2da   :  { %886 = vst.msk [vmem:[#allocation2 + $0x40] sm:$0xff] %vm75_vm0, %v870_v22  ;;  %v865_v58 = vadd.f32 %v837_v27, %v801_v24  ;;  %v851_v26 = vpop.xlane.xlu1 %850  ;;  %v903_v22 = vld [vmem:[#allocation3 + $0x48] sm:$0xff] }
 0x2db   :  { %1800 = vpush %v1554_v54  ;;  %v872_v28 = vadd.f32 %v851_v26, %v808_v25  ;;  %v905_v25 = vld [vmem:[#allocation3 + $0x58] sm:$0xff]  ;;  %v907_v26 = vld [vmem:[#allocation3 + $0x68] sm:$0xff] }
 0x2dc   :  { %881 = vst.msk [vmem:[#allocation2 + $0x18] sm:$0xff] %vm75_vm0, %v865_v58 }
 0x2dd   :  { %888 = vst.msk [vmem:[#allocation2 + $0x50] sm:$0xff] %vm75_vm0, %v872_v28  ;;  %v841_v53 = vpop.xlane.xlu0 %840 }
 0x2de   :  { %v867_v33 = vadd.f32 %v841_v53, %v803_v29  ;;  %v855_v43 = vpop.xlane.xlu1 %854 }
 0x2df   :  { %v874_v9 = vadd.f32 %v855_v43, %v810_v31 }
 0x2e0   :  { %883 = vst.msk [vmem:[#allocation2 + $0x28] sm:$0xff] %vm75_vm0, %v867_v33 }
 0x2e1   :  { %890 = vst.msk [vmem:[#allocation2 + $0x60] sm:$0xff] %vm75_vm0, %v874_v9  ;;  %v845_v57 = vpop.xlane.xlu0 %844 }
 0x2e2   :  { %v869_v56 = vadd.f32 %v845_v57, %v805_v41  ;;  %v859_v36 = vpop.xlane.xlu1 %858 }
 0x2e3   :  { %v876_v37 = vadd.f32 %v859_v36, %v812_v35  ;;  %v909_v35 = vld [vmem:[#allocation3 + $0x78] sm:$0xff] }
 0x2e4   :  { %885 = vst.msk [vmem:[#allocation2 + $0x38] sm:$0xff] %vm75_vm0, %v869_v56 }
 0x2e5   :  { %892 = vst.msk [vmem:[#allocation2 + $0x70] sm:$0xff] %vm75_vm0, %v876_v37  ;;  %v849_v40 = vpop.xlane.xlu0 %848 }
 0x2e6   :  { %v871_v11 = vadd.f32 %v849_v40, %v807_v38  ;;  %v915_v19 = vpop.xlane.xlu1 %914 }
 0x2e7   :  { %v944_v42 = vadd.f32 %v915_v19, %v896_v39 }
 0x2e8   :  { %887 = vst.msk [vmem:[#allocation2 + $0x48] sm:$0xff] %vm75_vm0, %v871_v11 }
 0x2e9   :  { %960 = vst.msk [vmem:[#allocation3 + $0x10] sm:$0xff] %vm75_vm0, %v944_v42  ;;  %v853_v60 = vpop.xlane.xlu0 %852 }
 0x2ea   :  { %v873_v61 = vadd.f32 %v853_v60, %v809_v14  ;;  %v919_v10 = vpop.xlane.xlu1 %918 }
 0x2eb   :  { %v946_v63 = vadd.f32 %v919_v10, %v898_v46 }
 0x2ec   :  { %889 = vst.msk [vmem:[#allocation2 + $0x58] sm:$0xff] %vm75_vm0, %v873_v61 }
 0x2ed   :  { %962 = vst.msk [vmem:[#allocation3 + $0x20] sm:$0xff] %vm75_vm0, %v946_v63  ;;  %v857_v30 = vpop.xlane.xlu0 %856 }
 0x2ee   :  { %v875_v48 = vadd.f32 %v857_v30, %v811_v47  ;;  %v923_v50 = vpop.xlane.xlu1 %922 }
 0x2ef   :  { %v948_v51 = vadd.f32 %v923_v50, %v900_v23 }
 0x2f0   :  { %891 = vst.msk [vmem:[#allocation2 + $0x68] sm:$0xff] %vm75_vm0, %v875_v48 }
 0x2f1   :  { %964 = vst.msk [vmem:[#allocation3 + $0x30] sm:$0xff] %vm75_vm0, %v948_v51  ;;  %v861_v52 = vpop.xlane.xlu0 %860 }
 0x2f2   :  { %v877_v1 = vadd.f32 %v861_v52, %v813_v32  ;;  %v927_v0 = vpop.xlane.xlu1 %926 }
 0x2f3   :  { %v950_v17 = vadd.f32 %v927_v0, %v902_v44 }
 0x2f4   :  { %893 = vst.msk [vmem:[#allocation2 + $0x78] sm:$0xff] %vm75_vm0, %v877_v1 }
 0x2f5   :  { %966 = vst.msk [vmem:[#allocation3 + $0x40] sm:$0xff] %vm75_vm0, %v950_v17  ;;  %v917_v2 = vpop.xlane.xlu0 %916 }
 0x2f6   :  { %v945_v18 = vadd.f32 %v917_v2, %v897_v34  ;;  %v931_v13 = vpop.xlane.xlu1 %930 }
 0x2f7   :  { %v952_v3 = vadd.f32 %v931_v13, %v904_v59 }
 0x2f8   :  { %961 = vst.msk [vmem:[#allocation3 + $0x18] sm:$0xff] %vm75_vm0, %v945_v18 }
 0x2f9   :  { %968 = vst.msk [vmem:[#allocation3 + $0x50] sm:$0xff] %vm75_vm0, %v952_v3  ;;  %v921_v5 = vpop.xlane.xlu0 %920 }
 0x2fa   :  { %v947_v6 = vadd.f32 %v921_v5, %v899_v12  ;;  %v935_v7 = vpop.xlane.xlu1 %934 }
 0x2fb   :  { %v954_v45 = vadd.f32 %v935_v7, %v906_v4 }
 0x2fc   :  { %963 = vst.msk [vmem:[#allocation3 + $0x28] sm:$0xff] %vm75_vm0, %v947_v6 }
 0x2fd   :  { %970 = vst.msk [vmem:[#allocation3 + $0x60] sm:$0xff] %vm75_vm0, %v954_v45  ;;  %v925_v16 = vpop.xlane.xlu0 %924 }
 0x2fe   :  { %v949_v20 = vadd.f32 %v925_v16, %v901_v8  ;;  %v939_v49 = vpop.xlane.xlu1 %938 }
 0x2ff   :  { %v956_v21 = vadd.f32 %v939_v49, %v908_v15 }
 0x300   :  { %965 = vst.msk [vmem:[#allocation3 + $0x38] sm:$0xff] %vm75_vm0, %v949_v20 }
 0x301   :  { %972 = vst.msk [vmem:[#allocation3 + $0x70] sm:$0xff] %vm75_vm0, %v956_v21  ;;  %v929_v54 = vpop.xlane.xlu0 %928 }
 0x302   :  { %v951_v24 = vadd.f32 %v929_v54, %v903_v22 }
 0x304   :  { %967 = vst.msk [vmem:[#allocation3 + $0x48] sm:$0xff] %vm75_vm0, %v951_v24 }
 0x305   :  { %v933_v27 = vpop.xlane.xlu0 %932 }
 0x306   :  { %v953_v58 = vadd.f32 %v933_v27, %v905_v25 }
 0x307   :  { %s1795_s3 = spop %1794 }
 0x308   :  { %969 = vst.msk [vmem:[#allocation3 + $0x58] sm:$0xff] %vm75_vm0, %v953_v58  ;;  %v1561_v28 = vstv %s1795_s3  ;;  %s1797_s28 = spop %1796 }
 0x309   :  { %v1562_v29 = vsel %vm1560_vm10, %v1561_v28, 0.0  ;;  %v1565_v31 = vstv %s1797_s28  ;;  %v937_v62 = vpop.xlane.xlu0 %936 }
 0x30a   :  { %s1799_s13 = spop %1798  ;;  %v1566_v53 = vsel %vm1564_vm12, %v1565_v31, %v1562_v29  ;;  %v955_v43 = vadd.f32 %v937_v62, %v907_v26 }
 0x30b   :  { %v1569_v33 = vstv %s1799_s13 }
 0x30c   :  { %s1801_s14 = spop %1800  ;;  %v1570_v9 = vsel %vm1568_vm13, %v1569_v33, %v1566_v53  ;;  %971 = vst.msk [vmem:[#allocation3 + $0x68] sm:$0xff] %vm75_vm0, %v955_v43 }
 0x30d   :  { %v1573_v41 = vstv %s1801_s14  ;;  %v941_v56 = vpop.xlane.xlu0 %940 }
 0x30e   :  { %v1574_v57 = vsel %vm1572_vm14, %v1573_v41, %v1570_v9  ;;  %v957_v36 = vadd.f32 %v941_v56, %v909_v35 }
 0x30f   :  { %1575 = vst [vmem:[#allocation13] sm:$0xff] %v1574_v57 }
 0x310   :  { %1956 = shalt.err (!%p1953_p8)
}
 0x311   :  { %s1957_s19 = scalar_lea.hbm %s2458_s4, 128 }
 0x312   :  { %p1958_p9 = scmp.ne.s32.totalorder %s2458_s4, %s1957_s19  ;;  %p1961_p10 = scmp.lt.u32.totalorder %s1957_s19, %s2458_s4 }
 0x314   :  { %p1963_p11 = pnand %p1961_p10, %p1958_p9 }
 0x316   :  { %1966 = shalt.err (!%p1963_p11)
}
 0x317   :  { %1585 = dma.vmem_to_hbm [thread:$0]  %s1583_s1, 128, %s2458_s4, [#allocation7]   ;;  %973 = vst.msk [vmem:[#allocation3 + $0x78] sm:$0xff] %vm75_vm0, %v957_v36 }
 0x318   :  { %1973 = dma.done.wait [#allocation7], 128  }
 0x319   :  { %1974 = vsyncadd [#allocation7], 4294967168 }
 0x31a   :  { %1589 = vsyncpa [#allocation6], 1 }
 0x31b   :  { %1590 = vsyncpa [#allocation9], 1 }
 0x31c   :  { %1591 = vsyncpa [#allocation12], 1 }
 0x31d   :  { %1592 = vsyncpa [#allocation7], 1 }

</bundles_post_ra>
